<compile_context>
chip_gen: v6e
topology: v6e:2x2x1
jax: 0.10.0
libtpu: 0.0.40
codegen_flags: <defaults>
</compile_context>

<pallas_src>
import functools

import jax
import jax.numpy as jnp
from jax import lax
from jax.experimental import pallas as pl
from jax.experimental.pallas import tpu as pltpu

EPS = 1e-3


def conv_bn_kernel(w_ref, x_ref, g_ref, b_ref, o_ref, *, p_true, eps):
    # w_ref: (Ct, Cin) bf16   x_ref: (Cin, Pp) bf16 (cols >= p_true are zero)
    # g_ref/b_ref: (Ct, 1) f32   o_ref: (Ct, Pp) f32
    w = w_ref[...]
    x = x_ref[...]

    # 1x1 conv as a matmul: bf16 operands, f32 accumulation on the MXU.
    y = jnp.dot(w, x, preferred_element_type=jnp.float32)          # (Ct, Pp) f32

    inv_p = jnp.float32(1.0 / p_true)

    # Per-channel mean via a tiny matvec: sum_p y = W @ rowsum(X).
    # (Padded X columns are zero, so they do not contribute.)
    x_rowsum = jnp.sum(x.astype(jnp.float32), axis=1, keepdims=True)    # (Cin, 1)
    y_sum = jnp.dot(w.astype(jnp.float32), x_rowsum,
                    preferred_element_type=jnp.float32)                 # (Ct, 1)
    mean = y_sum * inv_p

    # Variance via sum of squares (padded y columns are exactly zero).
    sumsq = jnp.sum(y * y, axis=1, keepdims=True)                       # (Ct, 1)
    var = sumsq * inv_p - mean * mean
    inv_std = lax.rsqrt(var + jnp.float32(eps))

    # Fold BN into a single per-channel affine; one streaming pass over y.
    scale = inv_std * g_ref[...]                                        # (Ct, 1)
    shift = b_ref[...] - mean * scale                                   # (Ct, 1)
    o_ref[...] = (y * scale + shift).astype(o_ref.dtype)


def conv2d_1x1_batchnorm(x, w, gamma, beta, *, eps=EPS):
    """x: (N, Cin, H, W) f32, w: (Cout, Cin, 1, 1) f32, gamma/beta: (Cout,) f32."""
    N, Cin, H, W_ = x.shape
    Cout = w.shape[0]
    P = N * H * W_
    P_pad = pl.cdiv(P, 128) * 128

    # NCHW -> (Cin, P), bf16 matmul operands, zero-pad P to lane-dense width.
    x2d = jnp.transpose(x, (1, 0, 2, 3)).reshape(Cin, P).astype(jnp.bfloat16)
    if P_pad != P:
        x2d = jnp.pad(x2d, ((0, 0), (0, P_pad - P)))
    w2d = w.reshape(Cout, Cin).astype(jnp.bfloat16)
    gamma2 = gamma.astype(jnp.float32).reshape(Cout, 1)
    beta2 = beta.astype(jnp.float32).reshape(Cout, 1)

    # Split Cout across the grid (BN stats are per-channel, so tiles are
    # independent); "parallel" lets v7x shard the two tiles across its 2 TCs.
    if Cout % 2 == 0 and (Cout // 2) % 8 == 0:
        tile_cout = Cout // 2
    else:
        tile_cout = Cout
    grid = (Cout // tile_cout,)

    kernel = functools.partial(conv_bn_kernel, p_true=P, eps=eps)

    out2d = pl.pallas_call(
        kernel,
        out_shape=jax.ShapeDtypeStruct((Cout, P_pad), jnp.float32),
        grid=grid,
        in_specs=[
            pl.BlockSpec((tile_cout, Cin), lambda i: (i, 0)),
            pl.BlockSpec((Cin, P_pad), lambda i: (0, 0)),
            pl.BlockSpec((tile_cout, 1), lambda i: (i, 0)),
            pl.BlockSpec((tile_cout, 1), lambda i: (i, 0)),
        ],
        out_specs=pl.BlockSpec((tile_cout, P_pad), lambda i: (i, 0)),
        compiler_params=pltpu.CompilerParams(
            dimension_semantics=("parallel",),
        ),
    )(w2d, x2d, gamma2, beta2)

    # (Cout, P_pad) -> (Cout, P) -> (N, Cout, H, W)
    out2d = out2d[:, :P]
    return jnp.transpose(out2d.reshape(Cout, N, H, W_), (1, 0, 2, 3))


if __name__ == "__main__":
    # Shapes from the module's forward: x107 = randn([1, 80, 14, 14])
    N, Cin, H, W = 1, 80, 14, 14
    Cout = 480

    key = jax.random.PRNGKey(0)
    kx, kw = jax.random.split(key)

    x = jax.random.normal(kx, (N, Cin, H, W), dtype=jnp.float32)
    # Conv2d weight (deterministic synthetic init); BatchNorm affine defaults.
    w = jax.random.normal(kw, (Cout, Cin, 1, 1), dtype=jnp.float32) * 0.05
    gamma = jnp.ones((Cout,), dtype=jnp.float32)
    beta = jnp.zeros((Cout,), dtype=jnp.float32)

    out = conv2d_1x1_batchnorm(x, w, gamma, beta)
    jax.block_until_ready(out)
    assert out.shape == (N, Cout, H, W)

    # Reference 1 (tight): matched precision — bf16 matmul operands with f32
    # accumulation, exact BN in f32. Validates the kernel math.
    w_bf = w.reshape(Cout, Cin).astype(jnp.bfloat16)
    y_bf = jnp.einsum(
        "oc,nchw->nohw", w_bf, x.astype(jnp.bfloat16),
        preferred_element_type=jnp.float32,
    )
    m = jnp.mean(y_bf, axis=(0, 2, 3), keepdims=True)
    v = jnp.mean((y_bf - m) ** 2, axis=(0, 2, 3), keepdims=True)
    ref_bf = (y_bf - m) * lax.rsqrt(v + EPS) * gamma.reshape(1, Cout, 1, 1) + \
        beta.reshape(1, Cout, 1, 1)
    err_tight = jnp.max(jnp.abs(out - ref_bf))
    assert err_tight < 2e-3, f"tight check failed: {err_tight}"

    # Reference 2 (loose): full-f32 conv + BN. Confirms the bf16 matmul
    # approximation is absorbed by the per-channel renormalization.
    y_f32 = jnp.einsum("oc,nchw->nohw", w.reshape(Cout, Cin), x)
    m32 = jnp.mean(y_f32, axis=(0, 2, 3), keepdims=True)
    v32 = jnp.mean((y_f32 - m32) ** 2, axis=(0, 2, 3), keepdims=True)
    ref_f32 = (y_f32 - m32) * lax.rsqrt(v32 + EPS) * gamma.reshape(1, Cout, 1, 1) + \
        beta.reshape(1, Cout, 1, 1)
    err_loose = jnp.max(jnp.abs(out - ref_f32))
    assert err_loose < 5e-2, f"loose check failed: {err_loose}"

    print("KERNEL_OK")
</pallas_src>

<mosaic_0001>
module attributes {stable_mosaic.version = 11 : i64} {
  func.func @conv_bn_kernel(%arg0: i32, %arg1: memref<240x80xbf16, #tpu.memory_space<vmem>>, %arg2: memref<80x256xbf16, #tpu.memory_space<vmem>>, %arg3: memref<240x1xf32, #tpu.memory_space<vmem>>, %arg4: memref<240x1xf32, #tpu.memory_space<vmem>>, %arg5: memref<240x256xf32, #tpu.memory_space<vmem>>) attributes {dimension_semantics = [#tpu.dimension_semantics<parallel>], iteration_bounds = array<i64: 2>, scalar_prefetch = 0 : i64, scratch_operands = 0 : i64, tpu.core_type = #tpu.core_type<tc>, window_params = [{transform_indices = @transform_0, window_bounds = array<i64: 240, 80>}, {pipeline_mode = #tpu.pipeline_mode<synchronous>, transform_indices = @transform_1, window_bounds = array<i64: 80, 256>}, {transform_indices = @transform_2, window_bounds = array<i64: 240, 1>}, {transform_indices = @transform_3, window_bounds = array<i64: 240, 1>}, {transform_indices = @transform_4, window_bounds = array<i64: 240, 256>}]} {
    %c0 = arith.constant 0 : index
    %c0_0 = arith.constant 0 : index
    %0 = vector.load %arg1[%c0, %c0_0] : memref<240x80xbf16, #tpu.memory_space<vmem>>, vector<240x80xbf16>
    %c0_1 = arith.constant 0 : index
    %c0_2 = arith.constant 0 : index
    %1 = vector.load %arg2[%c0_1, %c0_2] : memref<80x256xbf16, #tpu.memory_space<vmem>>, vector<80x256xbf16>
    %cst = arith.constant dense<0.000000e+00> : vector<240x256xf32>
    %2 = tpu.matmul %0, %1, %cst {dimension_numbers = #tpu.dot_dimension_numbers<[1], [0], [0], [1], [0, 0, 1, 1], [], []>} : vector<240x80xbf16>, vector<80x256xbf16>, vector<240x256xf32> -> vector<240x256xf32>
    %3 = arith.extf %1 : vector<80x256xbf16> to vector<80x256xf32>
    %cst_3 = arith.constant dense<0.000000e+00> : vector<80xf32>
    %4 = vector.multi_reduction <add>, %3, %cst_3 [1] : vector<80x256xf32> to vector<80xf32>
    %5 = vector.shape_cast %4 : vector<80xf32> to vector<80x1xf32>
    %6 = arith.extf %0 : vector<240x80xbf16> to vector<240x80xf32>
    %cst_4 = arith.constant dense<0.000000e+00> : vector<240x1xf32>
    %7 = tpu.matmul %6, %5, %cst_4 {dimension_numbers = #tpu.dot_dimension_numbers<[1], [0], [0], [1], [0, 0, 1, 1], [], []>} : vector<240x80xf32>, vector<80x1xf32>, vector<240x1xf32> -> vector<240x1xf32>
    %cst_5 = arith.constant 0.00510204071 : f32
    %8 = vector.broadcast %cst_5 : f32 to vector<240x1xf32>
    %9 = arith.mulf %7, %8 : vector<240x1xf32>
    %10 = arith.mulf %2, %2 : vector<240x256xf32>
    %cst_6 = arith.constant dense<0.000000e+00> : vector<240xf32>
    %11 = vector.multi_reduction <add>, %10, %cst_6 [1] : vector<240x256xf32> to vector<240xf32>
    %12 = vector.shape_cast %11 : vector<240xf32> to vector<240x1xf32>
    %cst_7 = arith.constant 0.00510204071 : f32
    %13 = vector.broadcast %cst_7 : f32 to vector<240x1xf32>
    %14 = arith.mulf %12, %13 : vector<240x1xf32>
    %15 = arith.mulf %9, %9 : vector<240x1xf32>
    %16 = arith.subf %14, %15 : vector<240x1xf32>
    %cst_8 = arith.constant 1.000000e-03 : f32
    %17 = vector.broadcast %cst_8 : f32 to vector<240x1xf32>
    %18 = arith.addf %16, %17 : vector<240x1xf32>
    %19 = math.rsqrt %18 : vector<240x1xf32>
    %c0_9 = arith.constant 0 : index
    %c0_10 = arith.constant 0 : index
    %20 = vector.load %arg3[%c0_9, %c0_10] : memref<240x1xf32, #tpu.memory_space<vmem>>, vector<240x1xf32>
    %21 = arith.mulf %19, %20 : vector<240x1xf32>
    %c0_11 = arith.constant 0 : index
    %c0_12 = arith.constant 0 : index
    %22 = vector.load %arg4[%c0_11, %c0_12] : memref<240x1xf32, #tpu.memory_space<vmem>>, vector<240x1xf32>
    %23 = arith.mulf %9, %21 : vector<240x1xf32>
    %24 = arith.subf %22, %23 : vector<240x1xf32>
    %25 = vector.broadcast %21 : vector<240x1xf32> to vector<240x256xf32>
    %26 = arith.mulf %2, %25 : vector<240x256xf32>
    %27 = vector.broadcast %24 : vector<240x1xf32> to vector<240x256xf32>
    %28 = arith.addf %26, %27 : vector<240x256xf32>
    %c0_13 = arith.constant 0 : index
    %c0_14 = arith.constant 0 : index
    %29 = vector.load %arg5[%c0_13, %c0_14] : memref<240x256xf32, #tpu.memory_space<vmem>>, vector<240x256xf32>
    tpu.vector_store %arg5[%c0_13, %c0_14], %28 {strides = array<i32>} : memref<240x256xf32, #tpu.memory_space<vmem>>, vector<240x256xf32>,
    return
  }
  func.func @transform_0(%arg0: i32) -> (i32, i32) {
    %c0_i32 = arith.constant 0 : i32
    %c0_i32_0 = arith.constant 0 : i32
    return %arg0, %c0_i32 : i32, i32
  }
  func.func @transform_1(%arg0: i32) -> (i32, i32) {
    %c0_i32 = arith.constant 0 : i32
    %c0_i32_0 = arith.constant 0 : i32
    %c0_i32_1 = arith.constant 0 : i32
    return %c0_i32, %c0_i32_0 : i32, i32
  }
  func.func @transform_2(%arg0: i32) -> (i32, i32) {
    %c0_i32 = arith.constant 0 : i32
    %c0_i32_0 = arith.constant 0 : i32
    return %arg0, %c0_i32 : i32, i32
  }
  func.func @transform_3(%arg0: i32) -> (i32, i32) {
    %c0_i32 = arith.constant 0 : i32
    %c0_i32_0 = arith.constant 0 : i32
    return %arg0, %c0_i32 : i32, i32
  }
  func.func @transform_4(%arg0: i32) -> (i32, i32) {
    %c0_i32 = arith.constant 0 : i32
    %c0_i32_0 = arith.constant 0 : i32
    return %arg0, %c0_i32 : i32, i32
  }
}

</mosaic_0001>

<bundles_post_ra>
// kernel: tpu_custom_call.1
= control target key start
LH: loop header
LB: loop body
LE: loop exit
PB: predicated region body
PF: predicated region fallthrough
CT: control target
= control target key end

     0   :  { %9 = vsyncpa [#allocation3], 0  ;;  %s3488_s0 = inlined_call_operand.vmem [shape: bf16[480,80], index: 0, kind: input, shape index: {}]   ;;  %s3489_s1 = inlined_call_operand.vmem [shape: bf16[80,256], index: 1, kind: input, shape index: {}]   ;;  %s3490_s2 = inlined_call_operand.vmem [shape: f32[480,1], index: 2, kind: input, shape index: {}]   ;;  %s3491_s3 = inlined_call_operand.vmem [shape: f32[480,1], index: 3, kind: input, shape index: {}]   ;;  %s3492_s4 = inlined_call_operand.hbm [shape: f32[480,256], index: 4, kind: output, shape index: {}]  }
   0x1   :  { %11 = vsyncpa [#allocation3 + $0x1], 0  ;;  %s2519_s15 = smov 0   ;;  %s2521_s16 = smov 0  }
   0x2   :  { %s2523_s17 = smov 0   ;;  %s2525_s18 = smov 0  }
   0x3 LB: > { %s2540_s19 = sadd.s32 4294967295, %s2488_s18   ;;  %s2084_s20 = sadd.s32 4294967294, %s2488_s18   ;;  %s2488_s18 = sphi %s2525_s18, %s3634_s18   ;;  %s2484_s17 = sphi %s2523_s17, %s3633_s17   ;;  %s2480_s16 = sphi %s2521_s16, %s3632_s16   ;;  %s2476_s15 = sphi %s2519_s15, %s3631_s15  }
   0x4   : > { %s2544_s21 = sadd.s32 1, %s2488_s18   ;;  %s123_s22 = sadd.s32 1, %s2484_s17 }
   0x5   : > { %s120_s23 = ssub.s32 %s2488_s18, %s2544_s21  ;;  %p133_p0 = scmp.ne.s32.totalorder %s2484_s17, %s2480_s16 }
   0x6   : > { %p121_p1 = scmp.eq.s32.totalorder %s120_s23, 0  ;;  %p134_p2 = scmp.eq.s32.totalorder %s2540_s19, 1 }
   0x7   : > { %p139_p3 = scmp.ne.s32.totalorder %s2480_s16, %s2476_s15  ;;  %p140_p4 = scmp.eq.s32.totalorder %s2084_s20, 1 }
   0x8   : > { %s2555_s24 = scalar_select %p121_p1, %s2484_s17, %s123_s22  }
   0x9   : > { %p2557_p5 = por %p134_p2, %p133_p0  ;;  %p2561_p6 = por %p140_p4, %p139_p3 }
   0xa   : > { %p2087_p7 = scmp.ge.s32.totalorder %s2488_s18, 1  ;;  %p188_p8 = scmp.lt.s32.totalorder %s2488_s18, 3 }
   0xc   : > { %p189_p9 = pnand %p2087_p7, %p188_p8 }
   0xe   : > { %192 = sbr.rel (%p189_p9) target bundleno = 674 (0x2a2), region = 36 }
  0x13   : > { %v282_v0 = vld [vmem:[%s3489_s1 + $0x40] sm:$0xff]  ;;  %v283_v1 = vld [vmem:[%s3489_s1 + $0x48] sm:$0xff]  ;;  %v280_v2 = vld [vmem:[%s3489_s1 + $0x30] sm:$0xff]  ;;  %s224_s7 = smul.u32 30, %s2540_s19  ;;  %v2490_v10 = vmov 0   ;;  %vm409_vm0 = vcmask 654336  }
  0x14   : > { %v2115_v3 = vcombine.high %v282_v0, %v283_v1  ;;  %v2114_v4 = vcombine.low %v282_v0, %v283_v1  ;;  %v656_v5 = vunpack.c.l.bf16 %v283_v1  ;;  %v657_v6 = vunpack.c.h.bf16 %v283_v1  ;;  %v281_v7 = vld [vmem:[%s3489_s1 + $0x38] sm:$0xff]  ;;  %v278_v8 = vld [vmem:[%s3489_s1 + $0x20] sm:$0xff]  ;;  %v279_v9 = vld [vmem:[%s3489_s1 + $0x28] sm:$0xff]  ;;  %487 = vmatprep.mubr.bf16.mxu0 %v2490_v10  ;;  %607 = vmatprep.mubr.bf16.mxu1 %v2490_v10  ;;  %s2167_s29 = smul.u32 7680, %s2540_s19 }
  0x15   : > { %v2113_v11 = vcombine.high %v280_v2, %v281_v7  ;;  %v654_v12 = vunpack.c.l.bf16 %v282_v0  ;;  %v655_v13 = vunpack.c.h.bf16 %v282_v0  ;;  %p2590_p10 = scmp.lt.s32.totalorder %s224_s7, 59  ;;  %2326 = vset.pattern.permute.xlu0 %v2490_v10  ;;  %2327 = vset.pattern.permute.xlu1 %v2490_v10  ;;  %v652_v15 = vunpack.c.l.bf16 %v281_v7  ;;  %v276_v25 = vld [vmem:[%s3489_s1 + $0x10] sm:$0xff]  ;;  %v277_v26 = vld [vmem:[%s3489_s1 + $0x18] sm:$0xff]  ;;  %v274_v35 = vld [vmem:[%s3489_s1] sm:$0xff] }
  0x16   : > { %461 = vmatprep.subr.bf16.mxu0 %v2115_v3  ;;  %v685_v14 = vadd.f32 %v657_v6, %v656_v5  ;;  %2273 = vmatprep.subr.bf16.mxu1 %v2115_v3  ;;  %v653_v16 = vunpack.c.h.bf16 %v281_v7  ;;  %v2112_v17 = vcombine.low %v280_v2, %v281_v7  ;;  %v2111_v18 = vcombine.high %v278_v8, %v279_v9  ;;  %v275_v36 = vld [vmem:[%s3489_s1 + $0x8] sm:$0xff]  ;;  %s3440_s8 = scalar_lea.hbm %s3492_s4, %s2167_s29 }
  0x17   : > { %462 = vmatpush1.bf16.msra.mxu0 %v2114_v4  ;;  %2278 = vmatpush1.bf16.msra.mxu1 %v2114_v4  ;;  %v650_v19 = vunpack.c.l.bf16 %v280_v2  ;;  %v651_v20 = vunpack.c.h.bf16 %v280_v2  ;;  %v682_v21 = vadd.f32 %v655_v13, %v654_v12  ;;  %v648_v23 = vunpack.c.l.bf16 %v279_v9  ;;  %s3636_s7 = smov (!%p2590_p10, %s224_s7), 59 }
  0x18   : > { %686 = vadd.xlane.f32.xlu0 %v685_v14  ;;  %463 = vmatprep.subr.bf16.mxu0 %v2113_v11  ;;  %v679_v22 = vadd.f32 %v653_v16, %v652_v15  ;;  %v649_v24 = vunpack.c.h.bf16 %v279_v9  ;;  %v646_v28 = vunpack.c.l.bf16 %v278_v8  ;;  %v647_v29 = vunpack.c.h.bf16 %v278_v8  ;;  %s2088_s6 = sshll.u32 %s3636_s7, 2  ;;  %s2089_s11 = sshll.u32 %s3636_s7, 3 }
  0x19   : > { %2274 = vmatprep.subr.bf16.mxu1 %v2113_v11  ;;  %v676_v27 = vadd.f32 %v651_v20, %v650_v19  ;;  %v2110_v30 = vcombine.low %v278_v8, %v279_v9  ;;  %v2109_v32 = vcombine.high %v276_v25, %v277_v26  ;;  %v644_v33 = vunpack.c.l.bf16 %v277_v26  ;;  %s2618_s10 = scalar_lea.vmem %s3488_s0, %s2088_s6  ;;  %s3044_s14 = scalar_lea.vmem %s3490_s2, %s2089_s11 }
  0x1a   : > { %680 = vadd.xlane.f32.xlu1 %v679_v22  ;;  %v673_v31 = vadd.f32 %v649_v24, %v648_v23  ;;  %v645_v34 = vunpack.c.h.bf16 %v277_v26  ;;  %v670_v37 = vadd.f32 %v647_v29, %v646_v28  ;;  %v642_v38 = vunpack.c.l.bf16 %v276_v25  ;;  %v2621_v49 = vld [vmem:[%s2618_s10] sm:$0xff]   ;;  %v2632_v53 = vld [vmem:[%s2618_s10 + $0x8] sm:$0xff]   ;;  %v2644_v55 = vld [vmem:[%s2618_s10 + $0x10] sm:$0xff]   ;;  %s3067_s23 = scalar_lea.vmem %s3491_s3, %s2089_s11  ;;  %s221_s7 = sand.u32 1, %s2480_s16  }
  0x1b   : > { %464 = vmatpush1.bf16.msra.mxu0 %v2112_v17  ;;  %2279 = vmatpush1.bf16.msra.mxu1 %v2112_v17  ;;  %v643_v39 = vunpack.c.h.bf16 %v276_v25  ;;  %v2108_v40 = vcombine.low %v276_v25, %v277_v26  ;;  %v2107_v42 = vcombine.high %v274_v35, %v275_v36  ;;  %v640_v43 = vunpack.c.l.bf16 %v275_v36  ;;  %v2624_v51 = vld [vmem:[%s2618_s10 + $0x60] sm:$0xff]   ;;  %v2636_v54 = vld [vmem:[%s2618_s10 + $0x68] sm:$0xff]   ;;  %v2648_v56 = vld [vmem:[%s2618_s10 + $0x70] sm:$0xff]   ;;  %s2283_s27 = smul.u32 480, %s221_s7  ;;  %s3448_s19 = scalar_lea.sflag [#allocation3], %s221_s7 }
  0x1c   : > { %683 = vadd.xlane.f32.xlu0 %v682_v21  ;;  %465 = vmatprep.subr.bf16.mxu0 %v2111_v18  ;;  %v667_v41 = vadd.f32 %v645_v34, %v644_v33  ;;  %v641_v44 = vunpack.c.h.bf16 %v275_v36  ;;  %v638_v46 = vunpack.c.l.bf16 %v274_v35  ;;  %v639_v47 = vunpack.c.h.bf16 %v274_v35  ;;  %v2657_v58 = vld [vmem:[%s2618_s10 + $0x18] sm:$0xff]   ;;  %v2664_v59 = vld [vmem:[%s2618_s10 + $0x20] sm:$0xff]   ;;  %v2670_v60 = vld [vmem:[%s2618_s10 + $0x28] sm:$0xff]  }
  0x1d   : > { %2275 = vmatprep.subr.bf16.mxu1 %v2111_v18  ;;  %v664_v45 = vadd.f32 %v643_v39, %v642_v38  ;;  %v2106_v48 = vcombine.low %v274_v35, %v275_v36  ;;  %v688_v57 = vunpack.c.l.bf16 %v2621_v49  ;;  %v2676_v61 = vld [vmem:[%s2618_s10 + $0x30] sm:$0xff]   ;;  %v2682_v62 = vld [vmem:[%s2618_s10 + $0x38] sm:$0xff]   ;;  %v2688_v63 = vld [vmem:[%s2618_s10 + $0x40] sm:$0xff]   ;;  %v689_v13 = vunpack.c.h.bf16 %v2621_v49  ;;  %s3311_s28 = scalar_lea.vmem [#allocation2], %s2283_s27 }
  0x1e   : > { %677 = vadd.xlane.f32.xlu1 %v676_v27  ;;  %v661_v50 = vadd.f32 %v641_v44, %v640_v43  ;;  %v658_v52 = vadd.f32 %v639_v47, %v638_v46  ;;  %v2694_v0 = vld [vmem:[%s2618_s10 + $0x48] sm:$0xff]   ;;  %v2700_v1 = vld [vmem:[%s2618_s10 + $0x50] sm:$0xff]   ;;  %v2706_v2 = vld [vmem:[%s2618_s10 + $0x58] sm:$0xff]   ;;  %v690_v14 = vunpack.c.l.bf16 %v2632_v53  ;;  %v691_v15 = vunpack.c.h.bf16 %v2632_v53  ;;  %s1998_s30 = sshll.u32 %s3311_s28, 4  ;;  %s2491_s10 = smov [#allocation2]   ;;  %s3442_s30 = int_to_ptr.vmem [resolvable:$true] %s1998_s30 }
  0x1f   : > { %466 = vmatpush1.bf16.msra.mxu0 %v2110_v30  ;;  %2280 = vmatpush1.bf16.msra.mxu1 %v2110_v30  ;;  %v692_v16 = vunpack.c.l.bf16 %v2644_v55  ;;  %v693_v17 = vunpack.c.h.bf16 %v2644_v55  ;;  %v694_v18 = vunpack.c.l.bf16 %v2657_v58  ;;  %v695_v19 = vunpack.c.h.bf16 %v2657_v58  ;;  %s2428_s9 = scalar_lea.vmem %s3442_s30, 7680  ;;  %s2432_s11 = sshll.u32 %s2491_s10, 4  ;;  %s2433_s11 = int_to_ptr.vmem [resolvable:$false] %s2432_s11 }
  0x20   : > { %674 = vadd.xlane.f32.xlu0 %v673_v31  ;;  %467 = vmatprep.subr.bf16.mxu0 %v2109_v32  ;;  %v696_v20 = vunpack.c.l.bf16 %v2664_v59  ;;  %v697_v21 = vunpack.c.h.bf16 %v2664_v59  ;;  %v698_v22 = vunpack.c.l.bf16 %v2670_v60  ;;  %v699_v23 = vunpack.c.h.bf16 %v2670_v60  ;;  %p2429_p11 = scmp.ne.s32.totalorder %s3442_s30, %s2428_s9  ;;  %s2434_s12 = scalar_lea.vmem %s2433_s11, 15360 }
  0x21   : > { %2276 = vmatprep.subr.bf16.mxu1 %v2109_v32  ;;  %v700_v24 = vunpack.c.l.bf16 %v2676_v61  ;;  %v701_v25 = vunpack.c.h.bf16 %v2676_v61  ;;  %v702_v26 = vunpack.c.l.bf16 %v2682_v62  ;;  %v703_v27 = vunpack.c.h.bf16 %v2682_v62  ;;  %p2435_p0 = scmp.lt.s32.totalorder %s3442_s30, %s2433_s11  ;;  %p2436_p1 = scmp.lt.s32.totalorder %s2434_s12, %s2428_s9 }
  0x22   : > { %671 = vadd.xlane.f32.xlu1 %v670_v37  ;;  %v704_v28 = vunpack.c.l.bf16 %v2688_v63  ;;  %v705_v29 = vunpack.c.h.bf16 %v2688_v63  ;;  %v706_v30 = vunpack.c.l.bf16 %v2694_v0  ;;  %v707_v31 = vunpack.c.h.bf16 %v2694_v0  ;;  %p2430_p12 = pnand %p2429_p11, %p2557_p5 }
  0x23   : > { %468 = vmatpush1.bf16.msra.mxu0 %v2108_v40  ;;  %2281 = vmatpush1.bf16.msra.mxu1 %v2108_v40  ;;  %v708_v32 = vunpack.c.l.bf16 %v2700_v1  ;;  %v709_v33 = vunpack.c.h.bf16 %v2700_v1  ;;  %v710_v34 = vunpack.c.l.bf16 %v2706_v2  ;;  %v711_v35 = vunpack.c.h.bf16 %v2706_v2  ;;  %p2437_p2 = por %p2436_p1, %p2435_p0 }
  0x24   : > { %668 = vadd.xlane.f32.xlu0 %v667_v41  ;;  %469 = vmatprep.subr.bf16.mxu0 %v2107_v42  ;;  %v712_v36 = vunpack.c.l.bf16 %v2624_v51  ;;  %v713_v37 = vunpack.c.h.bf16 %v2624_v51  ;;  %v714_v38 = vunpack.c.l.bf16 %v2636_v54  ;;  %v715_v39 = vunpack.c.h.bf16 %v2636_v54  ;;  %p2431_p13 = pneg %p2430_p12 }
  0x25   : > { %2277 = vmatprep.subr.bf16.mxu1 %v2107_v42  ;;  %v716_v40 = vunpack.c.l.bf16 %v2648_v56  ;;  %v717_v44 = vunpack.c.h.bf16 %v2648_v56 }
  0x26   : > { %665 = vadd.xlane.f32.xlu1 %v664_v45  ;;  %p2438_p3 = pnand %p2437_p2, %p2431_p13 }
  0x27   : > { %470 = vmatpush1.bf16.msra.mxu0 %v2106_v48  ;;  %2282 = vmatpush1.bf16.msra.mxu1 %v2106_v48 }
  0x28   : > { %662 = vadd.xlane.f32.xlu0 %v661_v50 }
  0x2a   : > { %2116 = vmatmul.mubr.msk.bf16.vlgmr.msra.gmra.mxu0 %vm409_vm0, %v2621_v49  ;;  %659 = vadd.xlane.f32.xlu1 %v658_v52 }
  0x2b   : > { %2128 = vmatmul.mubr.msk.bf16.vlgmr.msra.gmra.mxu1 %vm409_vm0, %v2624_v51  ;;  %497 = vmatprep.mubr.bf16.mxu0 %v2490_v10 }
  0x2c   : > { %617 = vmatprep.mubr.bf16.mxu1 %v2490_v10 }
  0x32   : > { %2117 = vmatmul.mubr.msk.bf16.gmra.mxu0 %vm409_vm0, %v2632_v53 }
  0x33   : > { %2129 = vmatmul.mubr.msk.bf16.gmra.mxu1 %vm409_vm0, %v2636_v54  ;;  %507 = vmatprep.mubr.bf16.mxu0 %v2490_v10 }
  0x34   : > { %627 = vmatprep.mubr.bf16.mxu1 %v2490_v10 }
  0x3a   : > { %2118 = vmatmul.mubr.msk.bf16.gmra.mxu0 %vm409_vm0, %v2644_v55 }
  0x3b   : > { %2130 = vmatmul.mubr.msk.bf16.gmra.mxu1 %vm409_vm0, %v2648_v56  ;;  %517 = vmatprep.mubr.bf16.mxu0 %v2490_v10 }
  0x3c   : > { %2228 = vmatprep.mubr.msk.f32.mxu1 %vm409_vm0, %v688_v57 }
  0x42   : > { %2119 = vmatmul.mubr.msk.bf16.gmra.mxu0 %vm409_vm0, %v2657_v58 }
  0x43   : > { %527 = vmatprep.mubr.bf16.mxu0 %v2490_v10 }
  0x4a   : > { %2120 = vmatmul.mubr.msk.bf16.gmra.mxu0 %vm409_vm0, %v2664_v59 }
  0x4b   : > { %537 = vmatprep.mubr.bf16.mxu0 %v2490_v10 }
  0x52   : > { %2121 = vmatmul.mubr.msk.bf16.gmra.mxu0 %vm409_vm0, %v2670_v60 }
  0x53   : > { %547 = vmatprep.mubr.bf16.mxu0 %v2490_v10 }
  0x5a   : > { %2122 = vmatmul.mubr.msk.bf16.gmra.mxu0 %vm409_vm0, %v2676_v61 }
  0x5b   : > { %557 = vmatprep.mubr.bf16.mxu0 %v2490_v10 }
  0x62   : > { %2123 = vmatmul.mubr.msk.bf16.gmra.mxu0 %vm409_vm0, %v2682_v62 }
  0x63   : > { %567 = vmatprep.mubr.bf16.mxu0 %v2490_v10 }
  0x6a   : > { %2124 = vmatmul.mubr.msk.bf16.gmra.mxu0 %vm409_vm0, %v2688_v63 }
  0x6b   : > { %577 = vmatprep.mubr.bf16.mxu0 %v2490_v10 }
  0x72   : > { %2125 = vmatmul.mubr.msk.bf16.gmra.mxu0 %vm409_vm0, %v2694_v0 }
  0x73   : > { %587 = vmatprep.mubr.bf16.mxu0 %v2490_v10 }
  0x7a   : > { %2126 = vmatmul.mubr.msk.bf16.gmra.mxu0 %vm409_vm0, %v2700_v1 }
  0x7b   : > { %597 = vmatprep.mubr.bf16.mxu0 %v2490_v10 }
  0x82   : > { %2127 = vmatmul.mubr.msk.bf16.gmra.mxu0 %vm409_vm0, %v2706_v2 }
  0xa1   : > { %v687_v3 = vpop.xlane.xlu0 %686 }
  0xa2   : > { %2208 = vmatprep.subr.mxu1 %v687_v3 }
  0xa3   : > { %2209 = vmatpush3.msra.mxu1 %v687_v3  ;;  %v681_v4 = vpop.xlane.xlu1 %680 }
  0xa5   : > { %v684_v5 = vpop.xlane.xlu0 %683 }
  0xa6   : > { %2210 = vmatprep.subr.mxu1 %v684_v5 }
  0xa7   : > { %2211 = vmatpush3.msra.mxu1 %v684_v5  ;;  %v678_v6 = vpop.xlane.xlu1 %677 }
  0xa8   : > { %2212 = vmatprep.subr.mxu1 %v681_v4 }
  0xa9   : > { %2213 = vmatpush3.msra.mxu1 %v681_v4  ;;  %v675_v7 = vpop.xlane.xlu0 %674 }
  0xaa   : > { %2214 = vmatprep.subr.mxu1 %v678_v6 }
  0xab   : > { %2215 = vmatpush3.msra.mxu1 %v678_v6  ;;  %v672_v8 = vpop.xlane.xlu1 %671 }
  0xac   : > { %2216 = vmatprep.subr.mxu1 %v675_v7 }
  0xad   : > { %2217 = vmatpush3.msra.mxu1 %v675_v7  ;;  %v669_v9 = vpop.xlane.xlu0 %668 }
  0xae   : > { %2218 = vmatprep.subr.mxu1 %v672_v8 }
  0xaf   : > { %2219 = vmatpush3.msra.mxu1 %v672_v8  ;;  %v666_v10 = vpop.xlane.xlu1 %665 }
  0xb0   : > { %2220 = vmatprep.subr.mxu1 %v669_v9 }
  0xb1   : > { %2221 = vmatpush3.msra.mxu1 %v669_v9  ;;  %v663_v11 = vpop.xlane.xlu0 %662 }
  0xb2   : > { %2222 = vmatprep.subr.mxu1 %v666_v10 }
  0xb3   : > { %2223 = vmatpush3.msra.mxu1 %v666_v10  ;;  %v660_v12 = vpop.xlane.xlu1 %659 }
  0xb4   : > { %2224 = vmatprep.subr.mxu1 %v663_v11 }
  0xb5   : > { %2225 = vmatpush3.msra.mxu1 %v663_v11 }
  0xb6   : > { %2226 = vmatprep.subr.mxu1 %v660_v12 }
  0xb7   : > { %2227 = vmatpush3.msra.mxu1 %v660_v12 }
  0xb8   : > { %2229 = vmatmul.mubr.msk.f32.vlgmr.msra.gmra.mxu1 %vm409_vm0, %v689_v13 }
  0xb9   : > { %2231 = vmatprep.mubr.msk.f32.mxu1 %vm409_vm0, %v690_v14 }
  0xbc   : > { %2232 = vmatmul.mubr.msk.f32.gmra.mxu1 %vm409_vm0, %v691_v15 }
  0xbd   : > { %2234 = vmatprep.mubr.msk.f32.mxu1 %vm409_vm0, %v692_v16 }
  0xc0   : > { %2235 = vmatmul.mubr.msk.f32.gmra.mxu1 %vm409_vm0, %v693_v17 }
  0xc1   : > { %2237 = vmatprep.mubr.msk.f32.mxu1 %vm409_vm0, %v694_v18 }
  0xc4   : > { %2238 = vmatmul.mubr.msk.f32.gmra.mxu1 %vm409_vm0, %v695_v19 }
  0xc5   : > { %2240 = vmatprep.mubr.msk.f32.mxu1 %vm409_vm0, %v696_v20 }
  0xc8   : > { %2241 = vmatmul.mubr.msk.f32.gmra.mxu1 %vm409_vm0, %v697_v21 }
  0xc9   : > { %2243 = vmatprep.mubr.msk.f32.mxu1 %vm409_vm0, %v698_v22 }
  0xcc   : > { %2244 = vmatmul.mubr.msk.f32.gmra.mxu1 %vm409_vm0, %v699_v23 }
  0xcd   : > { %2246 = vmatprep.mubr.msk.f32.mxu1 %vm409_vm0, %v700_v24 }
  0xd0   : > { %2247 = vmatmul.mubr.msk.f32.gmra.mxu1 %vm409_vm0, %v701_v25 }
  0xd1   : > { %2249 = vmatprep.mubr.msk.f32.mxu1 %vm409_vm0, %v702_v26 }
  0xd4   : > { %2250 = vmatmul.mubr.msk.f32.gmra.mxu1 %vm409_vm0, %v703_v27 }
  0xd5   : > { %2252 = vmatprep.mubr.msk.f32.mxu1 %vm409_vm0, %v704_v28 }
  0xd8   : > { %2253 = vmatmul.mubr.msk.f32.gmra.mxu1 %vm409_vm0, %v705_v29 }
  0xd9   : > { %2255 = vmatprep.mubr.msk.f32.mxu1 %vm409_vm0, %v706_v30 }
  0xdc   : > { %2256 = vmatmul.mubr.msk.f32.gmra.mxu1 %vm409_vm0, %v707_v31 }
  0xdd   : > { %2258 = vmatprep.mubr.msk.f32.mxu1 %vm409_vm0, %v708_v32 }
  0xe0   : > { %2259 = vmatmul.mubr.msk.f32.gmra.mxu1 %vm409_vm0, %v709_v33 }
  0xe1   : > { %2261 = vmatprep.mubr.msk.f32.mxu1 %vm409_vm0, %v710_v34 }
  0xe4   : > { %2262 = vmatmul.mubr.msk.f32.gmra.mxu1 %vm409_vm0, %v711_v35 }
  0xe5   : > { %2264 = vmatprep.mubr.msk.f32.mxu1 %vm409_vm0, %v712_v36 }
  0xe8   : > { %2265 = vmatmul.mubr.msk.f32.gmra.mxu1 %vm409_vm0, %v713_v37 }
  0xe9   : > { %2267 = vmatprep.mubr.msk.f32.mxu1 %vm409_vm0, %v714_v38 }
  0xea   : > { %v2764_v41 = vpop.f32.mrf.mxu0 }
  0xeb   : > { %v2766_v42 = vpop.f32.mrf.mxu1  ;;  %v1053_v45 = vmul.f32 %v2764_v41, %v2764_v41 }
  0xec   : > { %3541 = vst [vmem:[#allocation5_spill] sm:$0xff] %v2766_v42  ;;  %v2768_v43 = vpop.f32.mrf.mxu0  ;;  %2268 = vmatmul.mubr.msk.f32.gmra.mxu1 %vm409_vm0, %v715_v39  ;;  %v1101_v47 = vmul.f32 %v2766_v42, %v2766_v42 }
  0xed   : > { %v1054_v46 = vmul.f32 %v2768_v43, %v2768_v43  ;;  %2270 = vmatprep.mubr.msk.f32.mxu1 %vm409_vm0, %v716_v40  ;;  %v2779_v48 = vpop.f32.mrf.mxu1 }
  0xee   : > { %3542 = vst [vmem:[#allocation6_spill] sm:$0xff] %v2779_v48  ;;  %v2781_v49 = vpop.f32.mrf.mxu0  ;;  %v1102_v50 = vmul.f32 %v2779_v48, %v2779_v48 }
  0xef   : > { %v1113_v51 = vadd.f32 %v1054_v46, %v1053_v45  ;;  %v2785_v52 = vpop.f32.mrf.mxu1  ;;  %v1055_v54 = vmul.f32 %v2781_v49, %v2781_v49 }
  0xf0   : > { %3543 = vst [vmem:[#allocation7_spill] sm:$0xff] %v2785_v52  ;;  %v2787_v53 = vpop.f32.mrf.mxu0  ;;  %2271 = vmatmul.mubr.msk.f32.gmra.mxu1 %vm409_vm0, %v717_v44  ;;  %v1185_v57 = vadd.f32 %v1102_v50, %v1101_v47  ;;  %v1103_v60 = vmul.f32 %v2785_v52, %v2785_v52 }
  0xf1   : > { %v1056_v55 = vmul.f32 %v2787_v53, %v2787_v53  ;;  %1114 = vadd.xlane.f32.xlu0 %v1113_v51  ;;  %v2794_v56 = vpop.f32.mrf.mxu1 }
  0xf2   : > { %3544 = vst [vmem:[#allocation8_spill] sm:$0xff] %v2794_v56  ;;  %v2796_v58 = vpop.f32.mrf.mxu0  ;;  %v1104_v61 = vmul.f32 %v2794_v56, %v2794_v56 }
  0xf3   : > { %v1057_v59 = vmul.f32 %v2796_v58, %v2796_v58  ;;  %v1116_v62 = vadd.f32 %v1056_v55, %v1055_v54  ;;  %v2804_v63 = vpop.f32.mrf.mxu1 }
  0xf4   : > { %3545 = vst [vmem:[#allocation9_spill] sm:$0xff] %v2804_v63  ;;  %v2806_v0 = vpop.f32.mrf.mxu0  ;;  %v1105_v2 = vmul.f32 %v2804_v63, %v2804_v63  ;;  %v1188_v6 = vadd.f32 %v1104_v61, %v1103_v60 }
  0xf5   : > { %v1058_v1 = vmul.f32 %v2806_v0, %v2806_v0  ;;  %1186 = vadd.xlane.f32.xlu0 %v1185_v57  ;;  %1117 = vadd.xlane.f32.xlu1 %v1116_v62  ;;  %v2812_v3 = vpop.f32.mrf.mxu1 }
  0xf6   : > { %3546 = vst [vmem:[#allocation10_spill] sm:$0xff] %v2812_v3  ;;  %v2814_v4 = vpop.f32.mrf.mxu0  ;;  %v1106_v5 = vmul.f32 %v2812_v3, %v2812_v3 }
  0xf7   : > { %v1119_v7 = vadd.f32 %v1058_v1, %v1057_v59  ;;  %v2818_v8 = vpop.f32.mrf.mxu1  ;;  %v1059_v9 = vmul.f32 %v2814_v4, %v2814_v4 }
  0xf8   : > { %3547 = vst [vmem:[#allocation11_spill] sm:$0xff] %v2818_v8  ;;  %v2822_v10 = vpop.f32.mrf.mxu0  ;;  %v1107_v12 = vmul.f32 %v2818_v8, %v2818_v8  ;;  %v1191_v14 = vadd.f32 %v1106_v5, %v1105_v2  ;;  %v1355_v8 = vld [vmem:[%s3044_s14 + $0x10] sm:$0xff] }
  0xf9   : > { %v1060_v11 = vmul.f32 %v2822_v10, %v2822_v10  ;;  %1189 = vadd.xlane.f32.xlu1 %v1188_v6  ;;  %1120 = vadd.xlane.f32.xlu0 %v1119_v7  ;;  %v2828_v13 = vpop.f32.mrf.mxu1 }
  0xfa   : > { %3548 = vst [vmem:[#allocation12_spill] sm:$0xff] %v2828_v13  ;;  %v2830_v15 = vpop.f32.mrf.mxu0  ;;  %v1108_v16 = vmul.f32 %v2828_v13, %v2828_v13 }
  0xfb   : > { %v1061_v17 = vmul.f32 %v2830_v15, %v2830_v15  ;;  %v1122_v18 = vadd.f32 %v1060_v11, %v1059_v9  ;;  %v2836_v19 = vpop.f32.mrf.mxu1 }
  0xfc   : > { %3549 = vst [vmem:[#allocation13_spill] sm:$0xff] %v2836_v19  ;;  %v2838_v20 = vpop.f32.mrf.mxu0  ;;  %v1109_v22 = vmul.f32 %v2836_v19, %v2836_v19  ;;  %v1194_v24 = vadd.f32 %v1108_v16, %v1107_v12 }
  0xfd   : > { %v1062_v21 = vmul.f32 %v2838_v20, %v2838_v20  ;;  %1192 = vadd.xlane.f32.xlu0 %v1191_v14  ;;  %1123 = vadd.xlane.f32.xlu1 %v1122_v18  ;;  %v2844_v23 = vpop.f32.mrf.mxu1 }
  0xfe   : > { %3550 = vst [vmem:[#allocation14_spill] sm:$0xff] %v2844_v23  ;;  %v2846_v25 = vpop.f32.mrf.mxu0  ;;  %v1110_v26 = vmul.f32 %v2844_v23, %v2844_v23 }
  0xff   : > { %v1063_v27 = vmul.f32 %v2846_v25, %v2846_v25  ;;  %v1125_v28 = vadd.f32 %v1062_v21, %v1061_v17  ;;  %v2852_v29 = vpop.f32.mrf.mxu1 }
 0x100   : > { %3551 = vst [vmem:[#allocation15_spill] sm:$0xff] %v2852_v29  ;;  %v2854_v30 = vpop.f32.mrf.mxu0  ;;  %v1111_v32 = vmul.f32 %v2852_v29, %v2852_v29  ;;  %v1197_v34 = vadd.f32 %v1110_v26, %v1109_v22 }
 0x101   : > { %v1064_v31 = vmul.f32 %v2854_v30, %v2854_v30  ;;  %1195 = vadd.xlane.f32.xlu1 %v1194_v24  ;;  %1126 = vadd.xlane.f32.xlu0 %v1125_v28  ;;  %v2860_v33 = vpop.f32.mrf.mxu1 }
 0x102   : > { %3552 = vst [vmem:[#allocation16_spill] sm:$0xff] %v2860_v33  ;;  %v2862_v35 = vpop.f32.mrf.mxu0  ;;  %v1112_v36 = vmul.f32 %v2860_v33, %v2860_v33 }
 0x103   : > { %3553 = vst [vmem:[#allocation17_spill] sm:$0xff] %v2862_v35  ;;  %v1065_v37 = vmul.f32 %v2862_v35, %v2862_v35  ;;  %v1128_v38 = vadd.f32 %v1064_v31, %v1063_v27 }
 0x104   : > { %v2868_v39 = vpop.f32.mrf.mxu0  ;;  %v1200_v44 = vadd.f32 %v1112_v36, %v1111_v32 }
 0x105   : > { %3554 = vst [vmem:[#allocation18_spill] sm:$0xff] %v2868_v39  ;;  %v1066_v40 = vmul.f32 %v2868_v39, %v2868_v39  ;;  %1198 = vadd.xlane.f32.xlu0 %v1197_v34  ;;  %1129 = vadd.xlane.f32.xlu1 %v1128_v38 }
 0x106   : > { %v2872_v45 = vpop.f32.mrf.mxu0 }
 0x107   : > { %v1067_v46 = vmul.f32 %v2872_v45, %v2872_v45  ;;  %v1131_v47 = vadd.f32 %v1066_v40, %v1065_v37 }
 0x108   : > { %v2876_v50 = vpop.f32.mrf.mxu0 }
 0x109   : > { %3555 = vst [vmem:[#allocation19_spill] sm:$0xff] %v2876_v50  ;;  %v1068_v51 = vmul.f32 %v2876_v50, %v2876_v50  ;;  %1201 = vadd.xlane.f32.xlu1 %v1200_v44  ;;  %1132 = vadd.xlane.f32.xlu0 %v1131_v47  ;;  %v1422_v50 = vld [vmem:[%s3067_s23 + $0x48] sm:$0xff] }
 0x10a   : > { %v2880_v54 = vpop.f32.mrf.mxu0 }
 0x10b   : > { %3556 = vst [vmem:[#allocation20_spill] sm:$0xff] %v2880_v54  ;;  %v1069_v55 = vmul.f32 %v2880_v54, %v2880_v54  ;;  %v1134_v57 = vadd.f32 %v1068_v51, %v1067_v46 }
 0x10c   : > { %v2884_v59 = vpop.f32.mrf.mxu0 }
 0x10d   : > { %3557 = vst [vmem:[#allocation21_spill] sm:$0xff] %v2884_v59  ;;  %v1070_v60 = vmul.f32 %v2884_v59, %v2884_v59  ;;  %1135 = vadd.xlane.f32.xlu1 %v1134_v57 }
 0x10e   : > { %v2888_v61 = vpop.f32.mrf.mxu0 }
 0x10f   : > { %v1071_v62 = vmul.f32 %v2888_v61, %v2888_v61  ;;  %v1137_v1 = vadd.f32 %v1070_v60, %v1069_v55 }
 0x110   : > { %v2892_v2 = vpop.f32.mrf.mxu0 }
 0x111   : > { %v1072_v5 = vmul.f32 %v2892_v2, %v2892_v2  ;;  %1138 = vadd.xlane.f32.xlu0 %v1137_v1 }
 0x112   : > { %v2896_v6 = vpop.f32.mrf.mxu0 }
 0x113   : > { %3558 = vst [vmem:[#allocation22_spill] sm:$0xff] %v2896_v6  ;;  %v1073_v7 = vmul.f32 %v2896_v6, %v2896_v6  ;;  %v1140_v9 = vadd.f32 %v1072_v5, %v1071_v62 }
 0x114   : > { %v2900_v11 = vpop.f32.mrf.mxu0 }
 0x115   : > { %3559 = vst [vmem:[#allocation23_spill] sm:$0xff] %v2900_v11  ;;  %v1074_v12 = vmul.f32 %v2900_v11, %v2900_v11  ;;  %1141 = vadd.xlane.f32.xlu1 %v1140_v9  ;;  %v1356_v11 = vld [vmem:[%s3044_s14 + $0x18] sm:$0xff] }
 0x116   : > { %v2904_v14 = vpop.f32.mrf.mxu0 }
 0x117   : > { %3560 = vst [vmem:[#allocation24_spill] sm:$0xff] %v2904_v14  ;;  %v1075_v16 = vmul.f32 %v2904_v14, %v2904_v14  ;;  %v1143_v17 = vadd.f32 %v1074_v12, %v1073_v7 }
 0x118   : > { %v2908_v18 = vpop.f32.mrf.mxu0 }
 0x119   : > { %3561 = vst [vmem:[#allocation25_spill] sm:$0xff] %v2908_v18  ;;  %v1076_v21 = vmul.f32 %v2908_v18, %v2908_v18  ;;  %1144 = vadd.xlane.f32.xlu0 %v1143_v17 }
 0x11a   : > { %v2912_v22 = vpop.f32.mrf.mxu0 }
 0x11b   : > { %3562 = vst [vmem:[#allocation26_spill] sm:$0xff] %v2912_v22  ;;  %v1077_v24 = vmul.f32 %v2912_v22, %v2912_v22  ;;  %v1146_v26 = vadd.f32 %v1076_v21, %v1075_v16  ;;  %v1414_v22 = vld [vmem:[%s3067_s23 + $0x8] sm:$0xff] }
 0x11c   : > { %v2916_v27 = vpop.f32.mrf.mxu0 }
 0x11d   : > { %3563 = vst [vmem:[#allocation27_spill] sm:$0xff] %v2916_v27  ;;  %v1078_v28 = vmul.f32 %v2916_v27, %v2916_v27  ;;  %1147 = vadd.xlane.f32.xlu1 %v1146_v26 }
 0x11e   : > { %v2920_v31 = vpop.f32.mrf.mxu0 }
 0x11f   : > { %3564 = vst [vmem:[#allocation28_spill] sm:$0xff] %v2920_v31  ;;  %v1079_v32 = vmul.f32 %v2920_v31, %v2920_v31  ;;  %v1149_v34 = vadd.f32 %v1078_v28, %v1077_v24 }
 0x120   : > { %v2924_v36 = vpop.f32.mrf.mxu0 }
 0x121   : > { %3565 = vst [vmem:[#allocation29_spill] sm:$0xff] %v2924_v36  ;;  %v1080_v37 = vmul.f32 %v2924_v36, %v2924_v36  ;;  %1150 = vadd.xlane.f32.xlu0 %v1149_v34  ;;  %v1413_v36 = vld [vmem:[%s3067_s23] sm:$0xff] }
 0x122   : > { %v2928_v38 = vpop.f32.mrf.mxu0 }
 0x123   : > { %3566 = vst [vmem:[#allocation30_spill] sm:$0xff] %v2928_v38  ;;  %v1081_v40 = vmul.f32 %v2928_v38, %v2928_v38  ;;  %v1152_v44 = vadd.f32 %v1080_v37, %v1079_v32 }
 0x124   : > { %v2932_v46 = vpop.f32.mrf.mxu0 }
 0x125   : > { %3567 = vst [vmem:[#allocation31_spill] sm:$0xff] %v2932_v46  ;;  %v1082_v47 = vmul.f32 %v2932_v46, %v2932_v46  ;;  %1153 = vadd.xlane.f32.xlu1 %v1152_v44 }
 0x126   : > { %v2936_v51 = vpop.f32.mrf.mxu0 }
 0x127   : > { %3568 = vst [vmem:[#allocation32_spill] sm:$0xff] %v2936_v51  ;;  %v1083_v55 = vmul.f32 %v2936_v51, %v2936_v51  ;;  %v1155_v57 = vadd.f32 %v1082_v47, %v1081_v40 }
 0x128   : > { %v2940_v60 = vpop.f32.mrf.mxu0 }
 0x129   : > { %3569 = vst [vmem:[#allocation33_spill] sm:$0xff] %v2940_v60  ;;  %v1084_v62 = vmul.f32 %v2940_v60, %v2940_v60  ;;  %1156 = vadd.xlane.f32.xlu0 %v1155_v57 }
 0x12a   : > { %v2944_v1 = vpop.f32.mrf.mxu0 }
 0x12b   : > { %3570 = vst [vmem:[#allocation34_spill] sm:$0xff] %v2944_v1  ;;  %v1085_v5 = vmul.f32 %v2944_v1, %v2944_v1  ;;  %v1158_v7 = vadd.f32 %v1084_v62, %v1083_v55 }
 0x12c   : > { %v2948_v9 = vpop.f32.mrf.mxu0 }
 0x12d   : > { %3571 = vst [vmem:[#allocation35_spill] sm:$0xff] %v2948_v9  ;;  %v1086_v12 = vmul.f32 %v2948_v9, %v2948_v9  ;;  %1159 = vadd.xlane.f32.xlu1 %v1158_v7 }
 0x12e   : > { %v2952_v16 = vpop.f32.mrf.mxu0 }
 0x12f   : > { %3572 = vst [vmem:[#allocation36_spill] sm:$0xff] %v2952_v16  ;;  %v1087_v17 = vmul.f32 %v2952_v16, %v2952_v16  ;;  %v1161_v21 = vadd.f32 %v1086_v12, %v1085_v5 }
 0x130   : > { %v2956_v24 = vpop.f32.mrf.mxu0 }
 0x131   : > { %3573 = vst [vmem:[#allocation37_spill] sm:$0xff] %v2956_v24  ;;  %v1088_v26 = vmul.f32 %v2956_v24, %v2956_v24  ;;  %1162 = vadd.xlane.f32.xlu0 %v1161_v21  ;;  %v1353_v24 = vld [vmem:[%s3044_s14] sm:$0xff] }
 0x132   : > { %v2960_v28 = vpop.f32.mrf.mxu0 }
 0x133   : > { %3574 = vst [vmem:[#allocation38_spill] sm:$0xff] %v2960_v28  ;;  %v1089_v32 = vmul.f32 %v2960_v28, %v2960_v28  ;;  %v1164_v34 = vadd.f32 %v1088_v26, %v1087_v17 }
 0x134   : > { %v2964_v37 = vpop.f32.mrf.mxu0 }
 0x135   : > { %3575 = vst [vmem:[#allocation39_spill] sm:$0xff] %v2964_v37  ;;  %v1090_v40 = vmul.f32 %v2964_v37, %v2964_v37  ;;  %1165 = vadd.xlane.f32.xlu1 %v1164_v34 }
 0x136   : > { %v2968_v44 = vpop.f32.mrf.mxu0 }
 0x137   : > { %3576 = vst [vmem:[#allocation40_spill] sm:$0xff] %v2968_v44  ;;  %v1091_v47 = vmul.f32 %v2968_v44, %v2968_v44  ;;  %v1167_v55 = vadd.f32 %v1090_v40, %v1089_v32 }
 0x138   : > { %v2972_v57 = vpop.f32.mrf.mxu0 }
 0x139   : > { %3577 = vst [vmem:[#allocation41_spill] sm:$0xff] %v2972_v57  ;;  %v1092_v62 = vmul.f32 %v2972_v57, %v2972_v57  ;;  %1168 = vadd.xlane.f32.xlu0 %v1167_v55 }
 0x13a   : > { %v2976_v5 = vpop.f32.mrf.mxu0 }
 0x13b   : > { %3578 = vst [vmem:[#allocation42_spill] sm:$0xff] %v2976_v5  ;;  %v1093_v7 = vmul.f32 %v2976_v5, %v2976_v5  ;;  %v1170_v12 = vadd.f32 %v1092_v62, %v1091_v47 }
 0x13c   : > { %v2980_v17 = vpop.f32.mrf.mxu0 }
 0x13d   : > { %3579 = vst [vmem:[#allocation43_spill] sm:$0xff] %v2980_v17  ;;  %v1094_v21 = vmul.f32 %v2980_v17, %v2980_v17  ;;  %1171 = vadd.xlane.f32.xlu1 %v1170_v12 }
 0x13e   : > { %v2984_v26 = vpop.f32.mrf.mxu0 }
 0x13f   : > { %3580 = vst [vmem:[#allocation44_spill] sm:$0xff] %v2984_v26  ;;  %v1095_v32 = vmul.f32 %v2984_v26, %v2984_v26  ;;  %v1173_v34 = vadd.f32 %v1094_v21, %v1093_v7 }
 0x140   : > { %v2988_v40 = vpop.f32.mrf.mxu0 }
 0x141   : > { %3581 = vst [vmem:[#allocation45_spill] sm:$0xff] %v2988_v40  ;;  %v1096_v55 = vmul.f32 %v2988_v40, %v2988_v40  ;;  %1174 = vadd.xlane.f32.xlu0 %v1173_v34 }
 0x142   : > { %v2992_v23 = vpop.f32.mrf.mxu0 }
 0x143   : > { %3582 = vst [vmem:[#allocation46_spill] sm:$0xff] %v2992_v23  ;;  %v1097_v47 = vmul.f32 %v2992_v23, %v2992_v23  ;;  %v1176_v62 = vadd.f32 %v1096_v55, %v1095_v32 }
 0x144   : > { %v2996_v19 = vpop.f32.mrf.mxu0 }
 0x145   : > { %3583 = vst [vmem:[#allocation47_spill] sm:$0xff] %v2996_v19  ;;  %v1098_v12 = vmul.f32 %v2996_v19, %v2996_v19  ;;  %1177 = vadd.xlane.f32.xlu1 %v1176_v62 }
 0x146   : > { %v3000_v17 = vpop.f32.mrf.mxu0 }
 0x147   : > { %3584 = vst [vmem:[#allocation48_spill] sm:$0xff] %v3000_v17  ;;  %v1099_v7 = vmul.f32 %v3000_v17, %v3000_v17  ;;  %v1179_v21 = vadd.f32 %v1098_v12, %v1097_v47 }
 0x148   : > { %v3004_v5 = vpop.f32.mrf.mxu0 }
 0x149   : > { %3585 = vst [vmem:[#allocation49_spill] sm:$0xff] %v3004_v5  ;;  %v1100_v34 = vmul.f32 %v3004_v5, %v3004_v5  ;;  %1180 = vadd.xlane.f32.xlu0 %v1179_v21 }
 0x14b   : > { %v1182_v23 = vadd.f32 %v1100_v34, %v1099_v7 }
 0x14d   : > { %1183 = vadd.xlane.f32.xlu1 %v1182_v23 }
 0x178   : > { %v2230_v32 = vpop.f32.mrf.mxu1 }
 0x179   : > { %v3010_v62 = vmul.f32 0.0051020407, %v2230_v32 }
 0x17a   : > { %v874_v55 = vpop.f32.mrf.mxu1  ;;  %v1115_v33 = vpop.xlane.xlu0 %1114 }
 0x17b   : > { %v3008_v29 = vmul.f32 0.0051020407, %v874_v55  ;;  %v1203_v47 = vmul.f32 0.0051020407, %v1115_v33  ;;  %v1234_v23 = vmul.f32 %v3010_v62, %v3010_v62 }
 0x17c   : > { %v2233_v19 = vpop.f32.mrf.mxu1 }
 0x17d   : > { %v1233_v17 = vmul.f32 %v3008_v29, %v3008_v29 }
 0x17e   : > { %v884_v12 = vpop.f32.mrf.mxu1  ;;  %v3014_v37 = vpop.xlane.xlu0 %1186 }
 0x17f   : > { %v1263_v28 = vsub.f32 %v1203_v47, %v1233_v17  ;;  %v3016_v5 = vmul.f32 0.0051020407, %v884_v12  ;;  %v1118_v7 = vpop.xlane.xlu1 %1117  ;;  %v3024_v47 = vmul.f32 0.0051020407, %v2233_v19 }
 0x180   : > { %v1204_v21 = vmul.f32 0.0051020407, %v1118_v7  ;;  %v2236_v34 = vpop.f32.mrf.mxu1 }
 0x181   : > { %v1293_v55 = vadd.f32 0.001, %v1263_v28  ;;  %v1235_v32 = vmul.f32 %v3016_v5, %v3016_v5  ;;  %v3033_v19 = vmul.f32 0.0051020407, %v2236_v34 }
 0x182   : > { %v1264_v40 = vsub.f32 %v1204_v21, %v1234_v23  ;;  %v894_v26 = vpop.f32.mrf.mxu1  ;;  %v1121_v33 = vpop.xlane.xlu0 %1120  ;;  %v1236_v23 = vmul.f32 %v3024_v47, %v3024_v47 }
 0x183   : > { %2368 = vrsqrt.f32 %v1293_v55  ;;  %v3022_v9 = vpop.xlane.xlu1 %1189  ;;  %v1205_v17 = vmul.f32 0.0051020407, %v1121_v33  ;;  %v3031_v21 = vmul.f32 0.0051020407, %v894_v26  ;;  %v1238_v34 = vmul.f32 %v3033_v19, %v3033_v19 }
 0x184   : > { %v1294_v12 = vadd.f32 0.001, %v1264_v40  ;;  %v2239_v1 = vpop.f32.mrf.mxu1 }
 0x185   : > { %v1265_v57 = vsub.f32 %v1205_v17, %v1235_v32  ;;  %v3069_v42 = vmul.f32 0.0051020407, %v2239_v1 }
 0x186   : > { %2370 = vrsqrt.f32 %v1294_v12  ;;  %v904_v7 = vpop.f32.mrf.mxu1  ;;  %v3026_v28 = vpop.xlane.xlu0 %1192 }
 0x187   : > { %v1124_v44 = vpop.xlane.xlu1 %1123  ;;  %v1295_v55 = vadd.f32 0.001, %v1265_v57  ;;  %v1237_v57 = vmul.f32 %v3031_v21, %v3031_v21 }
 0x188   : > { %v1206_v46 = vmul.f32 0.0051020407, %v1124_v44  ;;  %v2242_v33 = vpop.f32.mrf.mxu1 }
 0x189   : > { %2372 = vrsqrt.f32 %v1295_v55  ;;  %v3093_v56 = vmul.f32 0.0051020407, %v2242_v33 }
 0x18a   : > { %v1266_v40 = vsub.f32 %v1206_v46, %v1236_v23  ;;  %v3035_v38 = vpop.f32.mrf.mxu1  ;;  %v1127_v32 = vpop.xlane.xlu0 %1126 }
 0x18b   : > { %v3037_v17 = vpop.xlane.xlu1 %1195  ;;  %v1207_v26 = vmul.f32 0.0051020407, %v1127_v32 }
 0x18c   : > { %v1296_v44 = vadd.f32 0.001, %v1266_v40  ;;  %v3048_v46 = vpop.f32.mrf.mxu1  ;;  %v1354_v40 = vld [vmem:[%s3044_s14 + $0x8] sm:$0xff]  ;;  %v1230_v39 = vmul.f32 0.0051020407, %v3037_v17 }
 0x18d   : > { %v1267_v63 = vsub.f32 %v1207_v26, %v1237_v57  ;;  %v3071_v57 = vmul.f32 0.0051020407, %v904_v7 }
 0x18e   : > { %2374 = vrsqrt.f32 %v1296_v44  ;;  %v3052_v12 = vpop.f32.mrf.mxu1  ;;  %v3054_v23 = vpop.xlane.xlu0 %1198 }
 0x18f   : > { %v1130_v16 = vpop.xlane.xlu1 %1129 }
 0x190   : > { %v2369_v3 = vpop.eup %2368  ;;  %v1208_v60 = vmul.f32 0.0051020407, %v1130_v16  ;;  %v3057_v51 = vpop.f32.mrf.mxu1 }
 0x191   : > { %v1383_v55 = vmul.f32 %v2369_v3, %v1353_v24  ;;  %v1297_v3 = vadd.f32 0.001, %v1267_v63  ;;  %v1240_v63 = vmul.f32 %v3069_v42, %v3069_v42 }
 0x192   : > { %v1268_v32 = vsub.f32 %v1208_v60, %v1238_v34  ;;  %v3060_v48 = vpop.f32.mrf.mxu1  ;;  %v1133_v24 = vpop.xlane.xlu0 %1132 }
 0x193   : > { %v2371_v44 = vpop.eup %2370  ;;  %v3073_v16 = vpop.xlane.xlu1 %1201  ;;  %1505 = vperm.xlu0 %2326, %v1383_v55   ;;  %v1443_v27 = vmul.f32 %v1383_v55, %v3008_v29  ;;  %v1209_v31 = vmul.f32 0.0051020407, %v1133_v24 }
 0x194   : > { %v1298_v60 = vadd.f32 0.001, %v1268_v32  ;;  %v3075_v26 = vpop.f32.mrf.mxu1  ;;  %v1384_v34 = vmul.f32 %v2371_v44, %v1354_v40  ;;  %v1239_v32 = vmul.f32 %v3071_v57, %v3071_v57 }
 0x195   : > { %v1473_v13 = vsub.f32 %v1413_v36, %v1443_v27  ;;  %v3098_v27 = vmul.f32 0.0051020407, %v3035_v38  ;;  %v1416_v36 = vld [vmem:[%s3067_s23 + $0x18] sm:$0xff] }
 0x196   : > { %2376 = vrsqrt.f32 %v1298_v60  ;;  %1510 = vperm.xlu1 %2327, %v1384_v34   ;;  %v3080_v1 = vpop.f32.mrf.mxu1  ;;  %v1444_v7 = vmul.f32 %v1384_v34, %v3010_v62  ;;  %v2373_v60 = vpop.eup %2372  ;;  %v1269_v24 = vsub.f32 %v1209_v31, %v1239_v32 }
 0x197   : > { %v1136_v40 = vpop.xlane.xlu1 %1135  ;;  %2378 = vrsqrt.f32 %v1297_v3  ;;  %v1385_v59 = vmul.f32 %v2373_v60, %v1355_v8  ;;  %v1358_v60 = vld [vmem:[%s3044_s14 + $0x28] sm:$0xff] }
 0x198   : > { %v1210_v29 = vmul.f32 0.0051020407, %v1136_v40  ;;  %v3087_v55 = vpop.f32.mrf.mxu1  ;;  %v1474_v44 = vsub.f32 %v1414_v22, %v1444_v7  ;;  %v1299_v31 = vadd.f32 0.001, %v1269_v24  ;;  %v3116_v24 = vmul.f32 0.0051020407, %v3048_v46 }
 0x199   : > { %v1445_v32 = vmul.f32 %v1385_v59, %v3016_v5 }
 0x19a   : > { %v1270_v6 = vsub.f32 %v1210_v29, %v1240_v63  ;;  %1720 = vperm.xlu0 %2326, %v1474_v44   ;;  %1715 = vperm.xlu1 %2327, %v1473_v13   ;;  %v3091_v62 = vpop.f32.mrf.mxu1  ;;  %v1139_v3 = vpop.xlane.xlu0 %1138  ;;  %v1415_v44 = vld [vmem:[%s3067_s23 + $0x10] sm:$0xff] }
 0x19b   : > { %v2375_v34 = vpop.eup %2374  ;;  %v1211_v63 = vmul.f32 0.0051020407, %v1139_v3 }
 0x19c   : > { %v1300_v52 = vadd.f32 0.001, %v1270_v6  ;;  %v3095_v40 = vpop.f32.mrf.mxu1  ;;  %v1386_v22 = vmul.f32 %v2375_v34, %v1356_v11  ;;  %v1242_v6 = vmul.f32 %v3093_v56, %v3093_v56 }
 0x19e   : > { %2380 = vrsqrt.f32 %v1300_v52  ;;  %1515 = vperm.xlu1 %2327, %v1385_v59   ;;  %v3101_v13 = vpop.f32.mrf.mxu1  ;;  %v1142_v7 = vpop.xlane.xlu1 %1141  ;;  %v1446_v33 = vmul.f32 %v1386_v22, %v3024_v47  ;;  %v1241_v52 = vmul.f32 %v3098_v27, %v3098_v27 }
 0x19f   : > { %v1212_v8 = vmul.f32 0.0051020407, %v1142_v7  ;;  %2382 = vrsqrt.f32 %v1299_v31  ;;  %v1475_v7 = vsub.f32 %v1415_v44, %v1445_v32 }
 0x1a0   : > { %v3106_v11 = vpop.f32.mrf.mxu1  ;;  %v1476_v38 = vsub.f32 %v1416_v36, %v1446_v33  ;;  %v1271_v3 = vsub.f32 %v1211_v63, %v1241_v52  ;;  %v1244_v63 = vmul.f32 %v3116_v24, %v3116_v24 }
 0x1a1   : > { %v1272_v29 = vsub.f32 %v1212_v8, %v1242_v6  ;;  %v3121_v8 = vmul.f32 0.0051020407, %v3052_v12 }
 0x1a2   : > { %1730 = vperm.xlu0 %2326, %v1476_v38   ;;  %1520 = vperm.xlu1 %2327, %v1386_v22   ;;  %v3113_v47 = vpop.f32.mrf.mxu1  ;;  %v1145_v59 = vpop.xlane.xlu0 %1144  ;;  %v1418_v22 = vld [vmem:[%s3067_s23 + $0x28] sm:$0xff]  ;;  %v1357_v38 = vld [vmem:[%s3044_s14 + $0x20] sm:$0xff]  ;;  %v1301_v52 = vadd.f32 0.001, %v1271_v3 }
 0x1a3   : > { %v2377_v34 = vpop.eup %2376  ;;  %v1302_v36 = vadd.f32 0.001, %v1272_v29  ;;  %v1213_v32 = vmul.f32 0.0051020407, %v1145_v59 }
 0x1a4   : > { %v3118_v5 = vpop.f32.mrf.mxu1  ;;  %v1388_v33 = vmul.f32 %v2377_v34, %v1358_v60  ;;  %v2379_v6 = vpop.eup %2378  ;;  %v1243_v34 = vmul.f32 %v3121_v8, %v3121_v8 }
 0x1a5   : > { %2384 = vrsqrt.f32 %v1302_v36  ;;  %v1387_v12 = vmul.f32 %v2379_v6, %v1357_v38 }
 0x1a6   : > { %1725 = vperm.xlu1 %2327, %v1475_v7   ;;  %v3125_v54 = vpop.f32.mrf.mxu1  ;;  %v1148_v46 = vpop.xlane.xlu1 %1147  ;;  %v1448_v31 = vmul.f32 %v1388_v33, %v3033_v19  ;;  %v1360_v7 = vld [vmem:[%s3044_s14 + $0x38] sm:$0xff]  ;;  %v1228_v19 = vmul.f32 0.0051020407, %v3022_v9  ;;  %2386 = vrsqrt.f32 %v1301_v52  ;;  %v1273_v59 = vsub.f32 %v1213_v32, %v1243_v34 }
 0x1a7   : > { %v1214_v29 = vmul.f32 0.0051020407, %v1148_v46 }
 0x1a8   : > { %v2266_v44 = vpop.f32.mrf.mxu1  ;;  %v1478_v60 = vsub.f32 %v1418_v22, %v1448_v31  ;;  %v1447_v31 = vmul.f32 %v1387_v12, %v3031_v21  ;;  %v1303_v32 = vadd.f32 0.001, %v1273_v59 }
 0x1a9   : > { %v1274_v36 = vsub.f32 %v1214_v29, %v1244_v63  ;;  %v3132_v18 = vmul.f32 0.0051020407, %v2266_v44  ;;  %v1420_v29 = vld [vmem:[%s3067_s23 + $0x38] sm:$0xff]  ;;  %v1417_v44 = vld [vmem:[%s3067_s23 + $0x20] sm:$0xff] }
 0x1aa   : > { %1740 = vperm.xlu0 %2326, %v1478_v60   ;;  %1525 = vperm.xlu1 %2327, %v1387_v12   ;;  %v994_v14 = vpop.f32.mrf.mxu1 }
 0x1ab   : > { %v2381_v3 = vpop.eup %2380  ;;  %v1304_v46 = vadd.f32 0.001, %v1274_v36  ;;  %v1258_v6 = vmul.f32 %v3132_v18, %v3132_v18  ;;  %v3155_v17 = vmul.f32 0.0051020407, %v994_v14 }
 0x1ac   : > { %v2269_v22 = vpop.f32.mrf.mxu1  ;;  %v1390_v38 = vmul.f32 %v2381_v3, %v1360_v7  ;;  %v2383_v36 = vpop.eup %2382  ;;  %v1359_v3 = vld [vmem:[%s3044_s14 + $0x30] sm:$0xff] }
 0x1ad   : > { %2388 = vrsqrt.f32 %v1304_v46  ;;  %v1288_v63 = vsub.f32 %v1228_v19, %v1258_v6  ;;  %v3141_v9 = vmul.f32 0.0051020407, %v2269_v22  ;;  %v1151_v7 = vpop.xlane.xlu0 %1150  ;;  %v1477_v19 = vsub.f32 %v1417_v44, %v1447_v31 }
 0x1ae   : > { %1530 = vperm.xlu1 %2327, %v1388_v33   ;;  %v1004_v60 = vpop.f32.mrf.mxu1  ;;  %v1450_v52 = vmul.f32 %v1390_v38, %v3069_v42  ;;  %v3149_v46 = vmul.f32 0.0051020407, %v3060_v48  ;;  %v1154_v33 = vpop.xlane.xlu1 %1153  ;;  %v1362_v42 = vld [vmem:[%s3044_s14 + $0x48] sm:$0xff]  ;;  %v3153_v22 = vmul.f32 0.0051020407, %v3057_v51 }
 0x1af   : > { %v1318_v34 = vadd.f32 0.001, %v1288_v63  ;;  %v1260_v21 = vmul.f32 %v3141_v9, %v3141_v9  ;;  %v1215_v31 = vmul.f32 0.0051020407, %v1151_v7  ;;  %v1216_v48 = vmul.f32 0.0051020407, %v1154_v33 }
 0x1b0   : > { %v1480_v12 = vsub.f32 %v1420_v29, %v1450_v52  ;;  %v2272_v6 = vpop.f32.mrf.mxu1  ;;  %v1389_v29 = vmul.f32 %v2383_v36, %v1359_v3  ;;  %v1245_v35 = vmul.f32 %v3149_v46, %v3149_v46  ;;  %v1246_v14 = vmul.f32 %v3153_v22, %v3153_v22 }
 0x1b1   : > { %2390 = vrsqrt.f32 %v1318_v34  ;;  %v1290_v63 = vsub.f32 %v1230_v39, %v1260_v21  ;;  %v3157_v52 = vmul.f32 0.0051020407, %v2272_v6  ;;  %v1257_v39 = vmul.f32 %v3155_v17, %v3155_v17  ;;  %v1364_v6 = vld [vmem:[%s3044_s14 + $0x58] sm:$0xff] }
 0x1b2   : > { %v2385_v59 = vpop.eup %2384  ;;  %1750 = vperm.xlu0 %2326, %v1480_v12   ;;  %1735 = vperm.xlu1 %2327, %v1477_v19   ;;  %2392 = vrsqrt.f32 %v1303_v32  ;;  %v1227_v32 = vmul.f32 0.0051020407, %v3014_v37  ;;  %v1275_v36 = vsub.f32 %v1215_v31, %v1245_v35  ;;  %v3168_v7 = vmul.f32 0.0051020407, %v1004_v60 }
 0x1b3   : > { %v1320_v44 = vadd.f32 0.001, %v1290_v63  ;;  %v1392_v34 = vmul.f32 %v2385_v59, %v1362_v42  ;;  %v1449_v21 = vmul.f32 %v1389_v29, %v3071_v57  ;;  %v2387_v12 = vpop.eup %2386  ;;  %v1276_v19 = vsub.f32 %v1216_v48, %v1246_v14  ;;  %v1361_v42 = vld [vmem:[%s3044_s14 + $0x40] sm:$0xff]  ;;  %v1419_v59 = vld [vmem:[%s3067_s23 + $0x30] sm:$0xff] }
 0x1b4   : > { %v1262_v3 = vmul.f32 %v3157_v52, %v3157_v52  ;;  %v1287_v37 = vsub.f32 %v1227_v32, %v1257_v39  ;;  %v1305_v35 = vadd.f32 0.001, %v1275_v36  ;;  %v1259_v57 = vmul.f32 %v3168_v7, %v3168_v7 }
 0x1b5   : > { %v1452_v51 = vmul.f32 %v1392_v34, %v3093_v56  ;;  %2394 = vrsqrt.f32 %v1320_v44  ;;  %v1232_v56 = vmul.f32 0.0051020407, %v3073_v16  ;;  %v1391_v31 = vmul.f32 %v2387_v12, %v1361_v42 }
 0x1b6   : > { %1550 = vperm.xlu0 %2326, %v1392_v34   ;;  %1535 = vperm.xlu1 %2327, %v1389_v29   ;;  %v1378_v29 = vld [vmem:[%s3044_s14 + $0xc8] sm:$0xff]  ;;  %v1306_v44 = vadd.f32 0.001, %v1276_v19  ;;  %v1479_v34 = vsub.f32 %v1419_v59, %v1449_v21  ;;  %v1160_v14 = vpop.xlane.xlu1 %1159  ;;  %v3182_v16 = vmul.f32 0.0051020407, %v3075_v26  ;;  %2396 = vrsqrt.f32 %v1305_v35 }
 0x1b7   : > { %v1482_v33 = vsub.f32 %v1422_v50, %v1452_v51  ;;  %v1292_v48 = vsub.f32 %v1232_v56, %v1262_v3  ;;  %v1229_v50 = vmul.f32 0.0051020407, %v3026_v28  ;;  %v1451_v36 = vmul.f32 %v1391_v31, %v3098_v27  ;;  %v1363_v3 = vld [vmem:[%s3044_s14 + $0x50] sm:$0xff]  ;;  %v1014_v27 = vpop.f32.mrf.mxu1 }
 0x1b8   : > { %2398 = vrsqrt.f32 %v1306_v44  ;;  %v1218_v28 = vmul.f32 0.0051020407, %v1160_v14  ;;  %v1248_v26 = vmul.f32 %v3182_v16, %v3182_v16  ;;  %v3196_v44 = vmul.f32 0.0051020407, %v3087_v55  ;;  %v1423_v55 = vld [vmem:[%s3067_s23 + $0x50] sm:$0xff] }
 0x1b9   : > { %v1289_v32 = vsub.f32 %v1229_v50, %v1259_v57  ;;  %v1322_v21 = vadd.f32 0.001, %v1292_v48 }
 0x1ba   : > { %v2389_v63 = vpop.eup %2388  ;;  %1760 = vperm.xlu0 %2326, %v1482_v33   ;;  %1540 = vperm.xlu1 %2327, %v1390_v38   ;;  %v1317_v38 = vadd.f32 0.001, %v1287_v37  ;;  %v1424_v33 = vld [vmem:[%s3067_s23 + $0x58] sm:$0xff]  ;;  %v1278_v56 = vsub.f32 %v1218_v28, %v1248_v26  ;;  %v1365_v26 = vld [vmem:[%s3044_s14 + $0x60] sm:$0xff] }
 0x1bb   : > { %v1394_v60 = vmul.f32 %v2389_v63, %v1364_v6  ;;  %v1421_v6 = vld [vmem:[%s3067_s23 + $0x40] sm:$0xff]  ;;  %v1319_v42 = vadd.f32 0.001, %v1289_v32  ;;  %v1157_v63 = vpop.xlane.xlu0 %1156  ;;  %v1438_v32 = vld [vmem:[%s3067_s23 + $0xc8] sm:$0xff] }
 0x1bc   : > { %2400 = vrsqrt.f32 %v1317_v38  ;;  %v1481_v35 = vsub.f32 %v1421_v6, %v1451_v36  ;;  %v1217_v48 = vmul.f32 0.0051020407, %v1157_v63  ;;  %v1250_v36 = vmul.f32 %v3196_v44, %v3196_v44  ;;  %v1366_v6 = vld [vmem:[%s3044_s14 + $0x68] sm:$0xff] }
 0x1bd   : > { %v1454_v19 = vmul.f32 %v1394_v60, %v3116_v24  ;;  %2402 = vrsqrt.f32 %v1322_v21  ;;  %v3192_v24 = vmul.f32 0.0051020407, %v3080_v1 }
 0x1be   : > { %v2391_v51 = vpop.eup %2390  ;;  %1560 = vperm.xlu0 %2326, %v1394_v60   ;;  %1745 = vperm.xlu1 %2327, %v1479_v34   ;;  %v1380_v60 = vld [vmem:[%s3044_s14 + $0xd8] sm:$0xff]  ;;  %2404 = vrsqrt.f32 %v1319_v42  ;;  %v3214_v42 = vmul.f32 0.0051020407, %v3095_v40 }
 0x1bf   : > { %v1408_v39 = vmul.f32 %v2391_v51, %v1378_v29  ;;  %v2393_v12 = vpop.eup %2392  ;;  %v1484_v37 = vsub.f32 %v1424_v33, %v1454_v19  ;;  %v1166_v29 = vpop.xlane.xlu1 %1165  ;;  %v1308_v51 = vadd.f32 0.001, %v1278_v56  ;;  %v1247_v38 = vmul.f32 %v3192_v24, %v3192_v24  ;;  %v1377_v56 = vld [vmem:[%s3044_s14 + $0xc0] sm:$0xff] }
 0x1c0   : > { %v1393_v59 = vmul.f32 %v2393_v12, %v1363_v3  ;;  %v1220_v1 = vmul.f32 0.0051020407, %v1166_v29  ;;  %v1231_v3 = vmul.f32 0.0051020407, %v3054_v23  ;;  %v1252_v40 = vmul.f32 %v3214_v42, %v3214_v42 }
 0x1c1   : > { %v1468_v50 = vmul.f32 %v1408_v39, %v3132_v18  ;;  %v1277_v12 = vsub.f32 %v1217_v48, %v1247_v38  ;;  %2406 = vrsqrt.f32 %v1308_v51  ;;  %v3218_v48 = vmul.f32 0.0051020407, %v3091_v62 }
 0x1c2   : > { %1630 = vperm.xlu0 %2326, %v1408_v39   ;;  %1545 = vperm.xlu1 %2327, %v1391_v31   ;;  %v2395_v57 = vpop.eup %2394  ;;  %v3198_v31 = vmul.f32 0.0051020407, %v1014_v27  ;;  %v1453_v34 = vmul.f32 %v1393_v59, %v3121_v8  ;;  %v1280_v39 = vsub.f32 %v1220_v1, %v1250_v36 }
 0x1c3   : > { %v1410_v14 = vmul.f32 %v2395_v57, %v1380_v60  ;;  %v2397_v18 = vpop.eup %2396  ;;  %v1498_v21 = vsub.f32 %v1438_v32, %v1468_v50  ;;  %v1307_v27 = vadd.f32 0.001, %v1277_v12 }
 0x1c4   : > { %v1261_v8 = vmul.f32 %v3198_v31, %v3198_v31  ;;  %v1483_v28 = vsub.f32 %v1423_v55, %v1453_v34  ;;  %v1395_v29 = vmul.f32 %v2397_v18, %v1365_v26  ;;  %v1382_v34 = vld [vmem:[%s3044_s14 + $0xe8] sm:$0xff]  ;;  %v1379_v55 = vld [vmem:[%s3044_s14 + $0xd0] sm:$0xff]  ;;  %v1440_v18 = vld [vmem:[%s3067_s23 + $0xd8] sm:$0xff] }
 0x1c5   : > { %v2399_v19 = vpop.eup %2398  ;;  %2408 = vrsqrt.f32 %v1307_v27  ;;  %v1470_v32 = vmul.f32 %v1410_v14, %v3141_v9  ;;  %v1425_v26 = vld [vmem:[%s3067_s23 + $0x60] sm:$0xff]  ;;  %v1426_v27 = vld [vmem:[%s3067_s23 + $0x68] sm:$0xff] }
 0x1c6   : > { %1770 = vperm.xlu0 %2326, %v1484_v37   ;;  %1755 = vperm.xlu1 %2327, %v1481_v35   ;;  %v1172_v33 = vpop.xlane.xlu1 %1171  ;;  %v1163_v37 = vpop.xlane.xlu0 %1162  ;;  %v1310_v35 = vadd.f32 0.001, %v1280_v39  ;;  %v1396_v60 = vmul.f32 %v2399_v19, %v1366_v6  ;;  %v3231_v39 = vmul.f32 0.0051020407, %v3106_v11  ;;  %v3238_v11 = vmul.f32 0.0051020407, %v3101_v13 }
 0x1c7   : > { %v1222_v57 = vmul.f32 0.0051020407, %v1172_v33  ;;  %v1219_v1 = vmul.f32 0.0051020407, %v1163_v37  ;;  %v1500_v33 = vsub.f32 %v1440_v18, %v1470_v32  ;;  %v1428_v18 = vld [vmem:[%s3067_s23 + $0x78] sm:$0xff] }
 0x1c8   : > { %2410 = vrsqrt.f32 %v1310_v35  ;;  %v1456_v6 = vmul.f32 %v1396_v60, %v3153_v22  ;;  %v1251_v13 = vmul.f32 %v3238_v11, %v3238_v11 }
 0x1c9   : > { %v2401_v63 = vpop.eup %2400  ;;  %v1282_v62 = vsub.f32 %v1222_v57, %v1252_v40  ;;  %v3249_v40 = vmul.f32 0.0051020407, %v3118_v5  ;;  %v1370_v5 = vld [vmem:[%s3044_s14 + $0x88] sm:$0xff] }
 0x1ca   : > { %1640 = vperm.xlu0 %2326, %v1410_v14   ;;  %1555 = vperm.xlu1 %2327, %v1393_v59   ;;  %v1291_v59 = vsub.f32 %v1231_v3, %v1261_v8  ;;  %v2403_v23 = vpop.eup %2402  ;;  %v1407_v50 = vmul.f32 %v2401_v63, %v1377_v56  ;;  %v1249_v8 = vmul.f32 %v3218_v48, %v3218_v48  ;;  %v1368_v63 = vld [vmem:[%s3044_s14 + $0x78] sm:$0xff] }
 0x1cb   : > { %v2405_v38 = vpop.eup %2404  ;;  %v3225_v36 = vmul.f32 %v2403_v23, %v1382_v34  ;;  %v1312_v19 = vadd.f32 0.001, %v1282_v62  ;;  %v1254_v56 = vmul.f32 %v3231_v39, %v3231_v39  ;;  %v1437_v34 = vld [vmem:[%s3067_s23 + $0xc0] sm:$0xff]  ;;  %v1367_v62 = vld [vmem:[%s3044_s14 + $0x70] sm:$0xff] }
 0x1cc   : > { %v1321_v51 = vadd.f32 0.001, %v1291_v59  ;;  %v1409_v9 = vmul.f32 %v2405_v38, %v1379_v55  ;;  %v1279_v14 = vsub.f32 %v1219_v1, %v1249_v8 }
 0x1ce   : > { %1840 = vperm.xlu0 %2326, %v1498_v21   ;;  %1765 = vperm.xlu1 %2327, %v1483_v28   ;;  %v1178_v12 = vpop.xlane.xlu1 %1177  ;;  %2412 = vrsqrt.f32 %v1321_v51  ;;  %v1455_v21 = vmul.f32 %v1395_v29, %v3149_v46  ;;  %v1169_v28 = vpop.xlane.xlu0 %1168  ;;  %v1467_v46 = vmul.f32 %v1407_v50, %v3155_v17  ;;  %v1309_v37 = vadd.f32 0.001, %v1279_v14 }
 0x1cf   : > { %v1224_v3 = vmul.f32 0.0051020407, %v1178_v12  ;;  %v2407_v59 = vpop.eup %2406  ;;  %v1221_v35 = vmul.f32 0.0051020407, %v1169_v28  ;;  %2414 = vrsqrt.f32 %v1312_v19  ;;  %v3254_v12 = vmul.f32 0.0051020407, %v3113_v47 }
 0x1d0   : > { %v1485_v57 = vsub.f32 %v1425_v26, %v1455_v21  ;;  %2416 = vrsqrt.f32 %v1309_v37  ;;  %v1497_v32 = vsub.f32 %v1437_v34, %v1467_v46  ;;  %v1256_v14 = vmul.f32 %v3249_v40, %v3249_v40  ;;  %v1381_v26 = vld [vmem:[%s3044_s14 + $0xe0] sm:$0xff]  ;;  %v1439_v37 = vld [vmem:[%s3067_s23 + $0xd0] sm:$0xff] }
 0x1d1   : > { %v1284_v22 = vsub.f32 %v1224_v3, %v1254_v56  ;;  %v1281_v17 = vsub.f32 %v1221_v35, %v1251_v13  ;;  %v1253_v47 = vmul.f32 %v3254_v12, %v3254_v12 }
 0x1d2   : > { %1570 = vperm.xlu0 %2326, %v1396_v60   ;;  %1565 = vperm.xlu1 %2327, %v1395_v29   ;;  %v1486_v60 = vsub.f32 %v1426_v27, %v1456_v6  ;;  %v1398_v29 = vmul.f32 %v2407_v59, %v1368_v63  ;;  %v1175_v51 = vpop.xlane.xlu0 %1174  ;;  %v1469_v59 = vmul.f32 %v1409_v9, %v3168_v7 }
 0x1d3   : > { %v1314_v1 = vadd.f32 0.001, %v1284_v22  ;;  %v1311_v21 = vadd.f32 0.001, %v1281_v17  ;;  %v1223_v28 = vmul.f32 0.0051020407, %v1175_v51 }
 0x1d4   : > { %v1458_v55 = vmul.f32 %v1398_v29, %v3182_v16  ;;  %v1430_v22 = vld [vmem:[%s3067_s23 + $0x88] sm:$0xff]  ;;  %v1369_v51 = vld [vmem:[%s3044_s14 + $0x80] sm:$0xff] }
 0x1d5   : > { %2418 = vrsqrt.f32 %v1314_v1  ;;  %v1283_v27 = vsub.f32 %v1223_v28, %v1253_v47  ;;  %v1434_v47 = vld [vmem:[%s3067_s23 + $0xa8] sm:$0xff] }
 0x1d6   : > { %1650 = vperm.xlu0 %2326, %v3225_v36   ;;  %1625 = vperm.xlu1 %2327, %v1407_v50   ;;  %v1184_v23 = vpop.xlane.xlu1 %1183  ;;  %v2409_v50 = vpop.eup %2408  ;;  %2420 = vrsqrt.f32 %v1311_v21 }
 0x1d7   : > { %v1226_v38 = vmul.f32 0.0051020407, %v1184_v23  ;;  %v2411_v8 = vpop.eup %2410  ;;  %v1397_v19 = vmul.f32 %v2409_v50, %v1367_v62  ;;  %v1313_v7 = vadd.f32 0.001, %v1283_v27  ;;  %v1427_v50 = vld [vmem:[%s3067_s23 + $0x70] sm:$0xff]  ;;  %v1432_v62 = vld [vmem:[%s3067_s23 + $0x98] sm:$0xff] }
 0x1d8   : > { %v1400_v6 = vmul.f32 %v2411_v8, %v1370_v5  ;;  %v1374_v8 = vld [vmem:[%s3044_s14 + $0xa8] sm:$0xff] }
 0x1d9   : > { %v1286_v16 = vsub.f32 %v1226_v38, %v1256_v14  ;;  %v1457_v13 = vmul.f32 %v1397_v19, %v3192_v24 }
 0x1da   : > { %1850 = vperm.xlu0 %2326, %v1500_v33   ;;  %1635 = vperm.xlu1 %2327, %v1409_v9   ;;  %v1488_v33 = vsub.f32 %v1428_v18, %v1458_v55  ;;  %v1460_v46 = vmul.f32 %v1400_v6, %v3196_v44  ;;  %v1499_v9 = vsub.f32 %v1439_v37, %v1469_v59  ;;  %v1373_v37 = vld [vmem:[%s3044_s14 + $0xa0] sm:$0xff] }
 0x1db   : > { %v2413_v3 = vpop.eup %2412  ;;  %v1316_v56 = vadd.f32 0.001, %v1286_v16  ;;  %v1487_v1 = vsub.f32 %v1427_v50, %v1457_v13  ;;  %v1433_v13 = vld [vmem:[%s3067_s23 + $0xa0] sm:$0xff] }
 0x1dc   : > { %v3264_v63 = vmul.f32 %v2413_v3, %v1381_v26  ;;  %v2415_v35 = vpop.eup %2414  ;;  %v1490_v34 = vsub.f32 %v1430_v22, %v1460_v46  ;;  %v1371_v3 = vld [vmem:[%s3044_s14 + $0x90] sm:$0xff]  ;;  %v1376_v26 = vld [vmem:[%s3044_s14 + $0xb8] sm:$0xff] }
 0x1dd   : > { %v2417_v23 = vpop.eup %2416  ;;  %2422 = vrsqrt.f32 %v1316_v56  ;;  %v1431_v46 = vld [vmem:[%s3067_s23 + $0x90] sm:$0xff]  ;;  %v1436_v22 = vld [vmem:[%s3067_s23 + $0xb8] sm:$0xff] }
 0x1de   : > { %1780 = vperm.xlu0 %2326, %v1486_v60   ;;  %1775 = vperm.xlu1 %2327, %v1485_v57   ;;  %v1181_v57 = vpop.xlane.xlu0 %1180  ;;  %v1372_v60 = vld [vmem:[%s3044_s14 + $0x98] sm:$0xff]  ;;  %2424 = vrsqrt.f32 %v1313_v7 }
 0x1df   : > { %v1225_v44 = vmul.f32 0.0051020407, %v1181_v57  ;;  %v1402_v17 = vmul.f32 %v2415_v35, %v1372_v60 }
 0x1e1   : > { %v1462_v24 = vmul.f32 %v1402_v17, %v3214_v42 }
 0x1e2   : > { %1580 = vperm.xlu0 %2326, %v1398_v29   ;;  %1835 = vperm.xlu1 %2327, %v1497_v32   ;;  %v3271_v29 = vmul.f32 0.0051020407, %v3125_v54  ;;  %v1399_v32 = vmul.f32 %v2417_v23, %v1369_v51  ;;  %v2419_v55 = vpop.eup %2418  ;;  %v1442_v23 = vld [vmem:[%s3067_s23 + $0xe8] sm:$0xff] }
 0x1e3   : > { %v1492_v5 = vsub.f32 %v1432_v62, %v1462_v24  ;;  %v1404_v14 = vmul.f32 %v2419_v55, %v1374_v8  ;;  %v2421_v28 = vpop.eup %2420 }
 0x1e4   : > { %v1255_v54 = vmul.f32 %v3271_v29, %v3271_v29  ;;  %v1459_v21 = vmul.f32 %v1399_v32, %v3218_v48 }
 0x1e5   : > { %v1464_v16 = vmul.f32 %v1404_v14, %v3231_v39 }
 0x1e6   : > { %1790 = vperm.xlu0 %2326, %v1488_v33   ;;  %1575 = vperm.xlu1 %2327, %v1397_v19   ;;  %v1285_v38 = vsub.f32 %v1225_v44, %v1255_v54  ;;  %v1429_v19 = vld [vmem:[%s3067_s23 + $0x80] sm:$0xff]  ;;  %v1401_v33 = vmul.f32 %v2421_v28, %v1371_v3  ;;  %v1375_v44 = vld [vmem:[%s3044_s14 + $0xb0] sm:$0xff] }
 0x1e7   : > { %v1489_v42 = vsub.f32 %v1429_v19, %v1459_v21  ;;  %v1494_v59 = vsub.f32 %v1434_v47, %v1464_v16 }
 0x1e8   : > { %v1315_v18 = vadd.f32 0.001, %v1285_v38  ;;  %v1461_v48 = vmul.f32 %v1401_v33, %v3238_v11  ;;  %v1472_v11 = vmul.f32 %v3225_v36, %v3157_v52  ;;  %v1435_v52 = vld [vmem:[%s3067_s23 + $0xb0] sm:$0xff]  ;;  %v1471_v36 = vmul.f32 %v3264_v63, %v3198_v31 }
 0x1ea   : > { %1590 = vperm.xlu0 %2326, %v1400_v6   ;;  %1645 = vperm.xlu1 %2327, %v3264_v63   ;;  %2426 = vrsqrt.f32 %v1315_v18  ;;  %v2423_v6 = vpop.eup %2422  ;;  %v1491_v39 = vsub.f32 %v1431_v46, %v1461_v48 }
 0x1eb   : > { %v1406_v27 = vmul.f32 %v2423_v6, %v1376_v26  ;;  %v2425_v56 = vpop.eup %2424 }
 0x1ec   : > { %v1403_v35 = vmul.f32 %v2425_v56, %v1373_v37 }
 0x1ed   : > { %v1466_v57 = vmul.f32 %v1406_v27, %v3249_v40 }
 0x1ee   : > { %1800 = vperm.xlu0 %2326, %v1490_v34   ;;  %1845 = vperm.xlu1 %2327, %v1499_v9   ;;  %v1463_v60 = vmul.f32 %v1403_v35, %v3254_v12  ;;  %v1502_v34 = vsub.f32 %v1442_v23, %v1472_v11  ;;  %v1441_v12 = vld [vmem:[%s3067_s23 + $0xe0] sm:$0xff]  ;;  %v3588_v23 = vld [vmem:[#allocation18_spill] sm:$0xff] }
 0x1ef   : > { %v1496_v7 = vsub.f32 %v1436_v22, %v1466_v57  ;;  %v1501_v38 = vsub.f32 %v1441_v12, %v1471_v36  ;;  %v3589_v36 = vld [vmem:[#allocation24_spill] sm:$0xff] }
 0x1f0   : > { %v1493_v40 = vsub.f32 %v1433_v13, %v1463_v60  ;;  %v3586_v60 = vld [vmem:[#allocation19_spill] sm:$0xff] }
 0x1f2   : > { %1600 = vperm.xlu0 %2326, %v1402_v17   ;;  %1785 = vperm.xlu1 %2327, %v1487_v1  }
 0x1f6   : > { %1810 = vperm.xlu0 %2326, %v1492_v5   ;;  %1585 = vperm.xlu1 %2327, %v1399_v32  }
 0x1f7   : > { %v2427_v9 = vpop.eup %2426 }
 0x1f8   : > { %v1405_v17 = vmul.f32 %v2427_v9, %v1375_v44  ;;  %v3587_v9 = vld [vmem:[#allocation17_spill] sm:$0xff] }
 0x1fa   : > { %1610 = vperm.xlu0 %2326, %v1404_v14   ;;  %1795 = vperm.xlu1 %2327, %v1489_v42   ;;  %v1465_v50 = vmul.f32 %v1405_v17, %v3271_v29 }
 0x1fc   : > { %v1495_v51 = vsub.f32 %v1435_v52, %v1465_v50 }
 0x1fe   : > { %1820 = vperm.xlu0 %2326, %v1494_v59   ;;  %1595 = vperm.xlu1 %2327, %v1401_v33  }
 0x202   : > { %1805 = vperm.xlu1 %2327, %v1491_v39   ;;  %1620 = vperm.xlu0 %2326, %v1406_v27  }
 0x206   : > { %1605 = vperm.xlu1 %2327, %v1403_v35   ;;  %1830 = vperm.xlu0 %2326, %v1496_v7  }
 0x20a   : > { %1815 = vperm.xlu1 %2327, %v1493_v40   ;;  %1860 = vperm.xlu0 %2326, %v1502_v34  }
 0x20e   : > { %1615 = vperm.xlu1 %2327, %v1405_v17   ;;  %v1506_v54 = vpop.permute.xlu0 %1505 }
 0x20f   : > { %v1653_v24 = vmul.f32 %v1506_v54, %v2764_v41  ;;  %v1654_v32 = vmul.f32 %v1506_v54, %v2768_v43 }
 0x211   : > { %v1511_v1 = vpop.permute.xlu1 %1510 }
 0x212   : > { %1825 = vperm.xlu1 %2327, %v1495_v51   ;;  %v1655_v29 = vmul.f32 %v1511_v1, %v2781_v49  ;;  %v1656_v55 = vmul.f32 %v1511_v1, %v2787_v53  ;;  %v3590_v51 = vld [vmem:[#allocation25_spill] sm:$0xff]  ;;  %v3591_v1 = vld [vmem:[#allocation20_spill] sm:$0xff] }
 0x215   : > { %v1721_v62 = vpop.permute.xlu0 %1720  ;;  %v1716_v8 = vpop.permute.xlu1 %1715 }
 0x216   : > { %v1865_v18 = vadd.f32 %v1721_v62, %v1655_v29  ;;  %v1866_v31 = vadd.f32 %v1721_v62, %v1656_v55  ;;  %v1863_v63 = vadd.f32 %v1716_v8, %v1653_v24  ;;  %v1864_v5 = vadd.f32 %v1716_v8, %v1654_v32  ;;  %1855 = vperm.xlu1 %2327, %v1501_v38   ;;  %v3592_v24 = vld [vmem:[#allocation21_spill] sm:$0xff] }
 0x218   : > { %1925 = vst [vmem:[%s3311_s28 + $0x10] sm:$0xff] %v1865_v18  ;;  %1926 = vst [vmem:[%s3311_s28 + $0x18] sm:$0xff] %v1866_v31 }
 0x219   : > { %1923 = vst [vmem:[%s3311_s28] sm:$0xff] %v1863_v63  ;;  %1924 = vst [vmem:[%s3311_s28 + $0x8] sm:$0xff] %v1864_v5  ;;  %v1516_v41 = vpop.permute.xlu1 %1515 }
 0x21a   : > { %v1657_v21 = vmul.f32 %v1516_v41, %v2796_v58  ;;  %v1658_v28 = vmul.f32 %v1516_v41, %v2806_v0  ;;  %v3593_v41 = vld [vmem:[#allocation7_spill] sm:$0xff] }
 0x21d   : > { %v1521_v43 = vpop.permute.xlu1 %1520  ;;  %v1731_v14 = vpop.permute.xlu0 %1730 }
 0x21e   : > { %v1659_v49 = vmul.f32 %v1521_v43, %v2814_v4  ;;  %v1660_v53 = vmul.f32 %v1521_v43, %v2822_v10 }
 0x220   : > { %v1869_v19 = vadd.f32 %v1731_v14, %v1659_v49  ;;  %v1870_v3 = vadd.f32 %v1731_v14, %v1660_v53  ;;  %v3594_v49 = vld [vmem:[#allocation8_spill] sm:$0xff]  ;;  %v3595_v14 = vld [vmem:[#allocation22_spill] sm:$0xff] }
 0x221   : > { %v1726_v42 = vpop.permute.xlu1 %1725 }
 0x222   : > { %1929 = vst [vmem:[%s3311_s28 + $0x30] sm:$0xff] %v1869_v19  ;;  %1930 = vst [vmem:[%s3311_s28 + $0x38] sm:$0xff] %v1870_v3  ;;  %v1867_v16 = vadd.f32 %v1726_v42, %v1657_v21  ;;  %v1868_v33 = vadd.f32 %v1726_v42, %v1658_v28  ;;  %v3596_v28 = vld [vmem:[#allocation23_spill] sm:$0xff] }
 0x224   : > { %1927 = vst [vmem:[%s3311_s28 + $0x20] sm:$0xff] %v1867_v16  ;;  %1928 = vst [vmem:[%s3311_s28 + $0x28] sm:$0xff] %v1868_v33 }
 0x225   : > { %v1526_v4 = vpop.permute.xlu1 %1525  ;;  %v1741_v10 = vpop.permute.xlu0 %1740 }
 0x226   : > { %v1661_v47 = vmul.f32 %v1526_v4, %v2830_v15  ;;  %v1662_v26 = vmul.f32 %v1526_v4, %v2838_v20 }
 0x229   : > { %v1531_v6 = vpop.permute.xlu1 %1530 }
 0x22a   : > { %v1663_v58 = vmul.f32 %v1531_v6, %v2846_v25  ;;  %v1664_v0 = vmul.f32 %v1531_v6, %v2854_v30 }
 0x22c   : > { %v1873_v59 = vadd.f32 %v1741_v10, %v1663_v58  ;;  %v1874_v48 = vadd.f32 %v1741_v10, %v1664_v0 }
 0x22d   : > { %v1751_v27 = vpop.permute.xlu0 %1750  ;;  %v1736_v56 = vpop.permute.xlu1 %1735 }
 0x22e   : > { %1933 = vst [vmem:[%s3311_s28 + $0x50] sm:$0xff] %v1873_v59  ;;  %1934 = vst [vmem:[%s3311_s28 + $0x58] sm:$0xff] %v1874_v48  ;;  %v1871_v46 = vadd.f32 %v1736_v56, %v1661_v47  ;;  %v1872_v37 = vadd.f32 %v1736_v56, %v1662_v26  ;;  %v3597_v26 = vld [vmem:[#allocation11_spill] sm:$0xff]  ;;  %v3598_v48 = vld [vmem:[#allocation12_spill] sm:$0xff] }
 0x230   : > { %1931 = vst [vmem:[%s3311_s28 + $0x40] sm:$0xff] %v1871_v46  ;;  %1932 = vst [vmem:[%s3311_s28 + $0x48] sm:$0xff] %v1872_v37 }
 0x231   : > { %v1551_v39 = vpop.permute.xlu0 %1550  ;;  %v1536_v25 = vpop.permute.xlu1 %1535 }
 0x232   : > { %v1671_v30 = vmul.f32 %v1551_v39, %v2888_v61  ;;  %v1672_v15 = vmul.f32 %v1551_v39, %v2892_v2  ;;  %v1665_v13 = vmul.f32 %v1536_v25, %v3587_v9  ;;  %v1666_v44 = vmul.f32 %v1536_v25, %v3588_v23  ;;  %v3599_v25 = vld [vmem:[#allocation28_spill] sm:$0xff] }
 0x235   : > { %v1761_v20 = vpop.permute.xlu0 %1760  ;;  %v1541_v35 = vpop.permute.xlu1 %1540 }
 0x236   : > { %v1881_v57 = vadd.f32 %v1761_v20, %v1671_v30  ;;  %v1882_v22 = vadd.f32 %v1761_v20, %v1672_v15  ;;  %v1667_v11 = vmul.f32 %v1541_v35, %v2872_v45  ;;  %v1668_v7 = vmul.f32 %v1541_v35, %v3586_v60  ;;  %v3600_v15 = vld [vmem:[#allocation29_spill] sm:$0xff]  ;;  %v3601_v35 = vld [vmem:[#allocation26_spill] sm:$0xff] }
 0x238   : > { %1941 = vst [vmem:[%s3311_s28 + $0x90] sm:$0xff] %v1881_v57  ;;  %1942 = vst [vmem:[%s3311_s28 + $0x98] sm:$0xff] %v1882_v22  ;;  %v1877_v61 = vadd.f32 %v1751_v27, %v1667_v11  ;;  %v1878_v40 = vadd.f32 %v1751_v27, %v1668_v7  ;;  %v3602_v22 = vld [vmem:[#allocation27_spill] sm:$0xff] }
 0x239   : > { %v1561_v2 = vpop.permute.xlu0 %1560  ;;  %v1746_v34 = vpop.permute.xlu1 %1745 }
 0x23a   : > { %1937 = vst [vmem:[%s3311_s28 + $0x70] sm:$0xff] %v1877_v61  ;;  %1938 = vst [vmem:[%s3311_s28 + $0x78] sm:$0xff] %v1878_v40  ;;  %v1875_v17 = vadd.f32 %v1746_v34, %v1665_v13  ;;  %v1876_v50 = vadd.f32 %v1746_v34, %v1666_v44  ;;  %v1675_v12 = vmul.f32 %v1561_v2, %v3589_v36  ;;  %v3603_v61 = vld [vmem:[#allocation5_spill] sm:$0xff]  ;;  %v3605_v36 = vld [vmem:[#allocation32_spill] sm:$0xff] }
 0x23b   : > { %v1676_v54 = vmul.f32 %v1561_v2, %v3590_v51  ;;  %v3604_v2 = vld [vmem:[#allocation6_spill] sm:$0xff]  ;;  %v3606_v51 = vld [vmem:[#allocation33_spill] sm:$0xff] }
 0x23c   : > { %1935 = vst [vmem:[%s3311_s28 + $0x60] sm:$0xff] %v1875_v17  ;;  %1936 = vst [vmem:[%s3311_s28 + $0x68] sm:$0xff] %v1876_v50 }
 0x23d   : > { %v1631_v45 = vpop.permute.xlu0 %1630  ;;  %v1546_v52 = vpop.permute.xlu1 %1545 }
 0x23e   : > { %v1669_v38 = vmul.f32 %v1546_v52, %v3591_v1  ;;  %v1670_v32 = vmul.f32 %v1546_v52, %v3592_v24  ;;  %v1703_v43 = vmul.f32 %v1631_v45, %v3593_v41  ;;  %v1704_v53 = vmul.f32 %v1631_v45, %v3594_v49  ;;  %v3610_v41 = vld [vmem:[#allocation37_spill] sm:$0xff] }
 0x241   : > { %v1771_v29 = vpop.permute.xlu0 %1770  ;;  %v1756_v55 = vpop.permute.xlu1 %1755 }
 0x242   : > { %v1885_v62 = vadd.f32 %v1771_v29, %v1675_v12  ;;  %v1886_v8 = vadd.f32 %v1771_v29, %v1676_v54  ;;  %v1879_v18 = vadd.f32 %v1756_v55, %v1669_v38  ;;  %v1880_v31 = vadd.f32 %v1756_v55, %v1670_v32 }
 0x244   : > { %1945 = vst [vmem:[%s3311_s28 + $0xb0] sm:$0xff] %v1885_v62  ;;  %1946 = vst [vmem:[%s3311_s28 + $0xb8] sm:$0xff] %v1886_v8  ;;  %v3607_v62 = vld [vmem:[#allocation9_spill] sm:$0xff] }
 0x245   : > { %1939 = vst [vmem:[%s3311_s28 + $0x80] sm:$0xff] %v1879_v18  ;;  %1940 = vst [vmem:[%s3311_s28 + $0x88] sm:$0xff] %v1880_v31  ;;  %v1641_v63 = vpop.permute.xlu0 %1640  ;;  %v1556_v5 = vpop.permute.xlu1 %1555  ;;  %v3608_v18 = vld [vmem:[#allocation10_spill] sm:$0xff] }
 0x246   : > { %v1673_v21 = vmul.f32 %v1556_v5, %v3595_v14  ;;  %v1674_v19 = vmul.f32 %v1556_v5, %v3596_v28  ;;  %v1707_v59 = vmul.f32 %v1641_v63, %v3597_v26  ;;  %v1708_v27 = vmul.f32 %v1641_v63, %v3598_v48  ;;  %v3609_v63 = vld [vmem:[#allocation36_spill] sm:$0xff] }
 0x249   : > { %v1841_v3 = vpop.permute.xlu0 %1840  ;;  %v1766_v42 = vpop.permute.xlu1 %1765 }
 0x24a   : > { %v1913_v16 = vadd.f32 %v1841_v3, %v1703_v43  ;;  %v1914_v33 = vadd.f32 %v1841_v3, %v1704_v53  ;;  %v1883_v4 = vadd.f32 %v1766_v42, %v1673_v21  ;;  %v1884_v10 = vadd.f32 %v1766_v42, %v1674_v19  ;;  %v3611_v3 = vld [vmem:[#allocation30_spill] sm:$0xff] }
 0x24c   : > { %1973 = vst [vmem:[%s3311_s28 + $0x190] sm:$0xff] %v1913_v16  ;;  %1974 = vst [vmem:[%s3311_s28 + $0x198] sm:$0xff] %v1914_v33  ;;  %v3612_v16 = vld [vmem:[#allocation31_spill] sm:$0xff] }
 0x24d   : > { %1943 = vst [vmem:[%s3311_s28 + $0xa0] sm:$0xff] %v1883_v4  ;;  %1944 = vst [vmem:[%s3311_s28 + $0xa8] sm:$0xff] %v1884_v10  ;;  %v1571_v6 = vpop.permute.xlu0 %1570  ;;  %v1566_v58 = vpop.permute.xlu1 %1565 }
 0x24e   : > { %v1679_v30 = vmul.f32 %v1571_v6, %v3599_v25  ;;  %v1680_v20 = vmul.f32 %v1571_v6, %v3600_v15  ;;  %v1677_v57 = vmul.f32 %v1566_v58, %v3601_v35  ;;  %v1678_v11 = vmul.f32 %v1566_v58, %v3602_v22 }
 0x251   : > { %v3361_v0 = vpop.permute.xlu0 %1650  ;;  %v1626_v47 = vpop.permute.xlu1 %1625 }
 0x252   : > { %v1701_v40 = vmul.f32 %v1626_v47, %v3603_v61  ;;  %v1702_v34 = vmul.f32 %v1626_v47, %v3604_v2  ;;  %v3613_v47 = vld [vmem:[#allocation40_spill] sm:$0xff] }
 0x255   : > { %v1851_v56 = vpop.permute.xlu0 %1850  ;;  %v1636_v46 = vpop.permute.xlu1 %1635 }
 0x256   : > { %v1917_v37 = vadd.f32 %v1851_v56, %v1707_v59  ;;  %v1918_v39 = vadd.f32 %v1851_v56, %v1708_v27  ;;  %v1705_v8 = vmul.f32 %v1636_v46, %v3607_v62  ;;  %v1706_v31 = vmul.f32 %v1636_v46, %v3608_v18  ;;  %v3614_v59 = vld [vmem:[#allocation41_spill] sm:$0xff]  ;;  %v3623_v62 = vld [vmem:[#allocation15_spill] sm:$0xff]  ;;  %v3624_v18 = vld [vmem:[#allocation16_spill] sm:$0xff] }
 0x258   : > { %1977 = vst [vmem:[%s3311_s28 + $0x1b0] sm:$0xff] %v1917_v37  ;;  %1978 = vst [vmem:[%s3311_s28 + $0x1b8] sm:$0xff] %v1918_v39  ;;  %v3615_v39 = vld [vmem:[#allocation34_spill] sm:$0xff] }
 0x259   : > { %v1781_v60 = vpop.permute.xlu0 %1780  ;;  %v1776_v7 = vpop.permute.xlu1 %1775 }
 0x25a   : > { %v1889_v9 = vadd.f32 %v1781_v60, %v1679_v30  ;;  %v1890_v13 = vadd.f32 %v1781_v60, %v1680_v20  ;;  %v1887_v23 = vadd.f32 %v1776_v7, %v1677_v57  ;;  %v1888_v44 = vadd.f32 %v1776_v7, %v1678_v11  ;;  %v3616_v30 = vld [vmem:[#allocation35_spill] sm:$0xff]  ;;  %v3617_v11 = vld [vmem:[#allocation44_spill] sm:$0xff]  ;;  %v3618_v7 = vld [vmem:[#allocation45_spill] sm:$0xff] }
 0x25c   : > { %1949 = vst [vmem:[%s3311_s28 + $0xd0] sm:$0xff] %v1889_v9  ;;  %1950 = vst [vmem:[%s3311_s28 + $0xd8] sm:$0xff] %v1890_v13 }
 0x25d   : > { %1947 = vst [vmem:[%s3311_s28 + $0xc0] sm:$0xff] %v1887_v23  ;;  %1948 = vst [vmem:[%s3311_s28 + $0xc8] sm:$0xff] %v1888_v44  ;;  %v1581_v17 = vpop.permute.xlu0 %1580  ;;  %v1836_v50 = vpop.permute.xlu1 %1835 }
 0x25e   : > { %v1911_v45 = vadd.f32 %v1836_v50, %v1701_v40  ;;  %v1912_v52 = vadd.f32 %v1836_v50, %v1702_v34  ;;  %v1683_v12 = vmul.f32 %v1581_v17, %v3605_v36  ;;  %v1684_v54 = vmul.f32 %v1581_v17, %v3606_v51  ;;  %v3619_v40 = vld [vmem:[#allocation38_spill] sm:$0xff]  ;;  %v3620_v34 = vld [vmem:[#allocation39_spill] sm:$0xff] }
 0x260   : > { %1971 = vst [vmem:[%s3311_s28 + $0x180] sm:$0xff] %v1911_v45  ;;  %1972 = vst [vmem:[%s3311_s28 + $0x188] sm:$0xff] %v1912_v52 }
 0x261   : > { %v1791_v1 = vpop.permute.xlu0 %1790  ;;  %v1576_v38 = vpop.permute.xlu1 %1575 }
 0x262   : > { %v1893_v24 = vadd.f32 %v1791_v1, %v1683_v12  ;;  %v1894_v32 = vadd.f32 %v1791_v1, %v1684_v54  ;;  %v1681_v42 = vmul.f32 %v1576_v38, %v3611_v3  ;;  %v1682_v33 = vmul.f32 %v1576_v38, %v3612_v16  ;;  %v3621_v12 = vld [vmem:[#allocation48_spill] sm:$0xff]  ;;  %v3622_v54 = vld [vmem:[#allocation49_spill] sm:$0xff]  ;;  %v3627_v3 = vld [vmem:[#allocation46_spill] sm:$0xff] }
 0x263   : > { %v3628_v16 = vld [vmem:[#allocation47_spill] sm:$0xff] }
 0x264   : > { %1953 = vst [vmem:[%s3311_s28 + $0xf0] sm:$0xff] %v1893_v24  ;;  %1954 = vst [vmem:[%s3311_s28 + $0xf8] sm:$0xff] %v1894_v32 }
 0x265   : > { %v1591_v29 = vpop.permute.xlu0 %1590  ;;  %v3383_v55 = vpop.permute.xlu1 %1645 }
 0x266   : > { %v1687_v5 = vmul.f32 %v1591_v29, %v3609_v63  ;;  %v1688_v43 = vmul.f32 %v1591_v29, %v3610_v41  ;;  %v3625_v63 = vld [vmem:[#allocation42_spill] sm:$0xff]  ;;  %v3626_v41 = vld [vmem:[#allocation43_spill] sm:$0xff] }
 0x269   : > { %v1801_v49 = vpop.permute.xlu0 %1800  ;;  %v1846_v53 = vpop.permute.xlu1 %1845 }
 0x26a   : > { %v1897_v14 = vadd.f32 %v1801_v49, %v1687_v5  ;;  %v1898_v21 = vadd.f32 %v1801_v49, %v1688_v43  ;;  %v1915_v28 = vadd.f32 %v1846_v53, %v1705_v8  ;;  %v1916_v19 = vadd.f32 %v1846_v53, %v1706_v31 }
 0x26b   : > { %v1711_v8 = vmul.f32 %v3361_v0, %v3623_v62  ;;  %v1712_v31 = vmul.f32 %v3361_v0, %v3624_v18 }
 0x26c   : > { %1957 = vst [vmem:[%s3311_s28 + $0x110] sm:$0xff] %v1897_v14  ;;  %1958 = vst [vmem:[%s3311_s28 + $0x118] sm:$0xff] %v1898_v21 }
 0x26d   : > { %1975 = vst [vmem:[%s3311_s28 + $0x1a0] sm:$0xff] %v1915_v28  ;;  %1976 = vst [vmem:[%s3311_s28 + $0x1a8] sm:$0xff] %v1916_v19  ;;  %v1601_v4 = vpop.permute.xlu0 %1600  ;;  %v1786_v10 = vpop.permute.xlu1 %1785 }
 0x26e   : > { %v1891_v6 = vadd.f32 %v1786_v10, %v1681_v42  ;;  %v1892_v58 = vadd.f32 %v1786_v10, %v1682_v33  ;;  %v1691_v26 = vmul.f32 %v1601_v4, %v3613_v47  ;;  %v1692_v48 = vmul.f32 %v1601_v4, %v3614_v59 }
 0x270   : > { %1951 = vst [vmem:[%s3311_s28 + $0xe0] sm:$0xff] %v1891_v6  ;;  %1952 = vst [vmem:[%s3311_s28 + $0xe8] sm:$0xff] %v1892_v58  ;;  %v3629_v58 = vld [vmem:[#allocation13_spill] sm:$0xff] }
 0x271   : > { %v1811_v27 = vpop.permute.xlu0 %1810  ;;  %v1586_v56 = vpop.permute.xlu1 %1585  ;;  %v1709_v47 = vmul.f32 %v3383_v55, %v3629_v58 }
 0x272   : > { %v1901_v46 = vadd.f32 %v1811_v27, %v1691_v26  ;;  %v1902_v37 = vadd.f32 %v1811_v27, %v1692_v48  ;;  %v1685_v25 = vmul.f32 %v1586_v56, %v3615_v39  ;;  %v1686_v15 = vmul.f32 %v1586_v56, %v3616_v30  ;;  %v3630_v26 = vld [vmem:[#allocation14_spill] sm:$0xff] }
 0x273   : > { %v1710_v59 = vmul.f32 %v3383_v55, %v3630_v26 }
 0x274   : > { %1961 = vst [vmem:[%s3311_s28 + $0x130] sm:$0xff] %v1901_v46  ;;  %1962 = vst [vmem:[%s3311_s28 + $0x138] sm:$0xff] %v1902_v37 }
 0x275   : > { %v1611_v20 = vpop.permute.xlu0 %1610  ;;  %v1796_v35 = vpop.permute.xlu1 %1795 }
 0x276   : > { %v1895_v57 = vadd.f32 %v1796_v35, %v1685_v25  ;;  %v1896_v22 = vadd.f32 %v1796_v35, %v1686_v15  ;;  %v1695_v60 = vmul.f32 %v1611_v20, %v3617_v11  ;;  %v1696_v9 = vmul.f32 %v1611_v20, %v3618_v7 }
 0x278   : > { %1955 = vst [vmem:[%s3311_s28 + $0x100] sm:$0xff] %v1895_v57  ;;  %1956 = vst [vmem:[%s3311_s28 + $0x108] sm:$0xff] %v1896_v22 }
 0x279   : > { %v1821_v13 = vpop.permute.xlu0 %1820  ;;  %v1596_v23 = vpop.permute.xlu1 %1595 }
 0x27a   : > { %v1905_v44 = vadd.f32 %v1821_v13, %v1695_v60  ;;  %v1906_v61 = vadd.f32 %v1821_v13, %v1696_v9  ;;  %v1689_v2 = vmul.f32 %v1596_v23, %v3619_v40  ;;  %v1690_v17 = vmul.f32 %v1596_v23, %v3620_v34 }
 0x27c   : > { %1965 = vst [vmem:[%s3311_s28 + $0x150] sm:$0xff] %v1905_v44  ;;  %1966 = vst [vmem:[%s3311_s28 + $0x158] sm:$0xff] %v1906_v61 }
 0x27d   : > { %v1621_v50 = vpop.permute.xlu0 %1620  ;;  %v1806_v45 = vpop.permute.xlu1 %1805 }
 0x27e   : > { %v1899_v52 = vadd.f32 %v1806_v45, %v1689_v2  ;;  %v1900_v36 = vadd.f32 %v1806_v45, %v1690_v17  ;;  %v1699_v51 = vmul.f32 %v1621_v50, %v3621_v12  ;;  %v1700_v1 = vmul.f32 %v1621_v50, %v3622_v54 }
 0x280   : > { %1959 = vst [vmem:[%s3311_s28 + $0x120] sm:$0xff] %v1899_v52  ;;  %1960 = vst [vmem:[%s3311_s28 + $0x128] sm:$0xff] %v1900_v36 }
 0x281   : > { %v1831_v38 = vpop.permute.xlu0 %1830  ;;  %v1606_v24 = vpop.permute.xlu1 %1605 }
 0x282   : > { %v1909_v32 = vadd.f32 %v1831_v38, %v1699_v51  ;;  %v1910_v29 = vadd.f32 %v1831_v38, %v1700_v1  ;;  %v1693_v5 = vmul.f32 %v1606_v24, %v3625_v63  ;;  %v1694_v43 = vmul.f32 %v1606_v24, %v3626_v41 }
 0x284   : > { %1969 = vst [vmem:[%s3311_s28 + $0x170] sm:$0xff] %v1909_v32  ;;  %1970 = vst [vmem:[%s3311_s28 + $0x178] sm:$0xff] %v1910_v29 }
 0x285   : > { %v1861_v49 = vpop.permute.xlu0 %1860  ;;  %v1816_v53 = vpop.permute.xlu1 %1815 }
 0x286   : > { %v1921_v14 = vadd.f32 %v1861_v49, %v1711_v8  ;;  %v1922_v21 = vadd.f32 %v1861_v49, %v1712_v31  ;;  %v1903_v28 = vadd.f32 %v1816_v53, %v1693_v5  ;;  %v1904_v19 = vadd.f32 %v1816_v53, %v1694_v43 }
 0x288   : > { %1981 = vst [vmem:[%s3311_s28 + $0x1d0] sm:$0xff] %v1921_v14  ;;  %1982 = vst [vmem:[%s3311_s28 + $0x1d8] sm:$0xff] %v1922_v21 }
 0x289   : > { %1963 = vst [vmem:[%s3311_s28 + $0x140] sm:$0xff] %v1903_v28  ;;  %1964 = vst [vmem:[%s3311_s28 + $0x148] sm:$0xff] %v1904_v19  ;;  %v1616_v0 = vpop.permute.xlu1 %1615 }
 0x28a   : > { %v1697_v42 = vmul.f32 %v1616_v0, %v3627_v3  ;;  %v1698_v33 = vmul.f32 %v1616_v0, %v3628_v16 }
 0x28d   : > { %v1826_v4 = vpop.permute.xlu1 %1825 }
 0x28e   : > { %v1907_v10 = vadd.f32 %v1826_v4, %v1697_v42  ;;  %v1908_v6 = vadd.f32 %v1826_v4, %v1698_v33 }
 0x290   : > { %1967 = vst [vmem:[%s3311_s28 + $0x160] sm:$0xff] %v1907_v10  ;;  %1968 = vst [vmem:[%s3311_s28 + $0x168] sm:$0xff] %v1908_v6 }
 0x291   : > { %v1856_v48 = vpop.permute.xlu1 %1855 }
 0x292   : > { %v1919_v27 = vadd.f32 %v1856_v48, %v1709_v47  ;;  %v1920_v56 = vadd.f32 %v1856_v48, %v1710_v59 }
 0x294   : > { %1979 = vst [vmem:[%s3311_s28 + $0x1c0] sm:$0xff] %v1919_v27  ;;  %1980 = vst [vmem:[%s3311_s28 + $0x1c8] sm:$0xff] %v1920_v56 }
 0x295   : > { %2441 = shalt.err (!%p2438_p3)
}
 0x296   : > { %s2442_s13 = scalar_lea.hbm %s3440_s8, 7680  ;;  %s2446_s22 = scalar_lea.hbm %s3492_s4, 15360 }
 0x297   : > { %p2443_p4 = scmp.ne.s32.totalorder %s3440_s8, %s2442_s13  ;;  %p2447_p9 = scmp.lt.s32.totalorder %s3440_s8, %s3492_s4 }
 0x298   : > { %p2448_p10 = scmp.lt.s32.totalorder %s2446_s22, %s2442_s13 }
 0x299   : > { %p2444_p7 = pnand %p2443_p4, %p2557_p5 }
 0x29a   : > { %p2449_p11 = por %p2448_p10, %p2447_p9 }
 0x29b   : > { %p2445_p8 = pneg %p2444_p7 }
 0x29d   : > { %p2450_p12 = pnand %p2449_p11, %p2445_p8 }
 0x29f   : > { %2453 = shalt.err (!%p2450_p12)
}
 0x2a0   : > { %s2492_s27 = smov 256   ;;  %s2493_s28 = smov 16  }
 0x2a1   : > { %2284 = dma.vmem_to_hbm [thread:$0]  (%p2557_p5), %s3442_s30, 7680, %s3440_s8, %s3448_s19, %s2492_s27, %s2492_s27, %s2493_s28  }
 0x2a2 PF: > { %p2290_p13 = scmp.ge.s32.totalorder %s2488_s18, 2  ;;  %s2013_s29 = sand.u32 1, %s2476_s15  }
 0x2a3   : > { %s2014_s5 = scalar_lea.sflag [#allocation3], %s2013_s29 }
 0x2a4   : > { %p2287_p0 = pnand %p2290_p13, %p2561_p6 }
 0x2a6   : > { %p2288_p1 = pneg %p2287_p0 }
 0x2a8   : > { %2471 = dma.done.wait (%p2288_p1), %s2014_s5, 7680  }
 0x2a9   : > { %2473 = vsyncadd (%p2288_p1), %s2014_s5, 4294959616  ;;  %p14_p2 = scmp.ge.s32.totalorder %s2544_s21, 4   ;;  %s3631_s15 = smov %s2480_s16 }
 0x2aa   : > { %s3632_s16 = smov %s2484_s17  ;;  %s3633_s17 = smov %s2555_s24 }
 0x2ab   : > { %s3634_s18 = smov %s2544_s21  ;;  %16 = sbr.rel (!%p14_p2) target bundleno = 3 (0x3), region = 77 }
 0x2b0   :  { %2019 = vsyncpa [#allocation3], 1 }
 0x2b1   :  { %2021 = vsyncpa [#allocation3 + $0x1], 1 }

</bundles_post_ra>
